<compile_context>
chip_gen: v7x
topology: tpu7x:2x2x1
jax: 0.10.0
libtpu: 0.0.40
codegen_flags: <defaults>
</compile_context>

<pallas_src>
import functools

import jax
import jax.numpy as jnp
import numpy as np
from jax import lax
from jax.experimental import pallas as pl
from jax.experimental.pallas import tpu as pltpu

_NEG_FILL = -1e30  # fills padded logit lanes so they vanish from logsumexp

# Lazily flipped off if this JAX/Mosaic build rejects single-buffered
# (pipeline_mode=pl.Buffered(1)) grid-invariant inputs.
_FEATURES = {"single_buffer_consts": hasattr(pl, "Buffered")}


def _round_up(x, m):
    return (x + m - 1) // m * m


def _tpu_vmem_capacity_bytes():
    """Physical per-core VMEM (generation-aware); conservative v7x-sized fallback."""
    try:
        info = pltpu.get_tpu_info()
        cap = int(getattr(info, "vmem_capacity_bytes", 0) or 0)
        if cap > 0:
            return cap
    except Exception:
        pass
    return 64 << 20


def vim_kernel(x_ref, w1t_ref, b1_ref, wf_ref, bf_ref, *rest,
               alpha, num_classes, c_pad, c_out, use_gram):
    """One (row-tile i, K-tile k) grid step."""
    if use_gram:
        g_ref, out_ref, acc_ref = rest
    else:
        out_ref, acc_ref = rest

    k = pl.program_id(1)

    @pl.when(k == 0)
    def _():
        acc_ref[...] = jnp.zeros_like(acc_ref)

    # Backbone first layer, accumulated over K tiles (MXU, f32 accumulation).
    acc_ref[...] += jnp.dot(x_ref[...], w1t_ref[...],
                            preferred_element_type=jnp.float32)

    @pl.when(k == pl.num_programs(1) - 1)
    def _():
        # fc-input "features": relu(x @ W1^T + b1); padded feature lanes stay 0.
        h = jnp.maximum(acc_ref[...] + b1_ref[...], 0.0)        # (TM, D_feat_pad) f32

        # Fused lane-aligned head (single matmul):
        #   lanes [0, C)                : logits = h @ fc_w^T + fc_b
        #   lanes [C, c_pad)            : -1e30 bias -> vanish from logsumexp
        #   lanes [c_pad, c_pad+D_res)  : p = (h - u) @ R   (bias holds -u @ R)
        fused = jnp.dot(h.astype(wf_ref.dtype), wf_ref[...],
                        preferred_element_type=jnp.float32) + bf_ref[...]

        logits_blk = fused[:, :c_pad]          # lane-aligned, 128-multiple width
        p = fused[:, c_pad:]                   # lane-aligned, padded lanes are 0

        # ViM virtual logit.  Orthonormal R (standard ViM): ||p R^T|| = ||p||.
        # Otherwise the exact Gram identity ||p R^T||^2 = p (R^T R) p^T.
        if use_gram:
            pg = jnp.dot(p, g_ref[...], preferred_element_type=jnp.float32)
            v2 = jnp.sum(p * pg, axis=-1, keepdims=True)
        else:
            v2 = jnp.sum(p * p, axis=-1, keepdims=True)
        vlogit = jnp.sqrt(jnp.maximum(v2, 0.0)) * alpha

        # energy = -logsumexp(logits, -1), reduced over the lane-dense logits block.
        m = jnp.max(logits_blk, axis=-1, keepdims=True)
        energy = -(m + jnp.log(jnp.sum(jnp.exp(logits_blk - m), axis=-1,
                                       keepdims=True)))
        score = vlogit + energy                                  # (TM, 1)

        # Lane-dense (TM, c_out) output slab: cols [0,C) = logits, col C = score.
        col = lax.broadcasted_iota(jnp.int32, (fused.shape[0], c_out), 1)
        out_ref[...] = jnp.where(col < num_classes, fused[:, :c_out],
                                 jnp.where(col == num_classes, score, 0.0))


def prepare_vim_params(w1, b1, fc_w, fc_b, R, alpha, *, tk=None,
                       compute_dtype=jnp.float32):
    """One-time weight re-layout (hoisted out of the per-call path)."""
    w1 = np.asarray(w1, np.float32)          # (D_feat, D_in)
    b1 = np.asarray(b1, np.float32)          # (D_feat,)
    fc_w = np.asarray(fc_w, np.float32)      # (C, D_feat)
    fc_b = np.asarray(fc_b, np.float32)      # (C,)
    R = np.asarray(R, np.float32)            # (D_feat, D_res)

    D_feat, D_in = w1.shape
    C = fc_w.shape[0]
    D_res = R.shape[1]

    # u = -pinv(fc_w) @ fc_b   (ViMProtectedModule.__init__; one-time, host-side)
    u = -np.matmul(np.linalg.pinv(fc_w), fc_b)                   # (D_feat,)

    # Lane padding (MXU / vreg friendly).  Production D_feat is usually already
    # 128/256-aligned; the demo's 64 gets padded to 128.
    D_feat_pad = _round_up(D_feat, 128)
    C_pad = _round_up(C, 128)
    D_res_pad = _round_up(D_res, 128)
    N_out = C_pad + D_res_pad                # fused head width (128-multiple)
    C_out = _round_up(C + 1, 128)            # output slab width (logits + score)

    # Generation-aware VMEM budget & default K tile (v5e/v6e 128 MiB -> bigger tk).
    vmem_capacity = _tpu_vmem_capacity_bytes()
    vmem_cap = max(min(vmem_capacity - (16 << 20), 100 << 20), 32 << 20)
    if tk is None:
        tk = 1024 if vmem_capacity >= (96 << 20) else 512

    # K tiling of the flattened input dimension (zero-pad W1^T rows once here).
    if tk >= D_in:
        tk = D_in
        D_in_pad = D_in
    else:
        tk = max(128, (tk // 128) * 128)                         # lane-aligned K tile
        D_in_pad = _round_up(D_in, tk)

    w1t = np.zeros((D_in_pad, D_feat_pad), np.float32)
    w1t[:D_in, :D_feat] = w1.T

    b1p = np.zeros((1, D_feat_pad), np.float32)
    b1p[0, :D_feat] = b1

    # Fused, lane-aligned head weight  [fc_w^T | 0 | R | 0]  and its bias row.
    wf = np.zeros((D_feat_pad, N_out), np.float32)
    wf[:D_feat, :C] = fc_w.T
    wf[:D_feat, C_pad:C_pad + D_res] = R
    bias_f = np.zeros((1, N_out), np.float32)
    bias_f[0, :C] = fc_b
    bias_f[0, C:C_pad] = _NEG_FILL           # padded logit lanes ~ -inf for logsumexp
    bias_f[0, C_pad:C_pad + D_res] = -(u @ R)

    # Orthonormal-R fast path (standard ViM case): drop the Gram matrix entirely.
    gram = R.T @ R
    use_gram = not np.allclose(gram, np.eye(D_res, dtype=np.float32), atol=1e-4)
    G = None
    if use_gram:
        Gp = np.zeros((D_res_pad, D_res_pad), np.float32)
        Gp[:D_res, :D_res] = gram
        G = jnp.asarray(Gp, jnp.float32)

    return dict(
        w1t=jnp.asarray(w1t, compute_dtype),      # bf16 = MXU fast path (all gens)
        b1=jnp.asarray(b1p, jnp.float32),
        wf=jnp.asarray(wf, compute_dtype),        # bf16 halves resident head VMEM too
        bias_f=jnp.asarray(bias_f, jnp.float32),
        G=G, use_gram=bool(use_gram),
        alpha=float(alpha),
        D_in=D_in, D_in_pad=D_in_pad,
        D_feat=D_feat, D_feat_pad=D_feat_pad,
        C=C, C_pad=C_pad, C_out=C_out,
        D_res=D_res, D_res_pad=D_res_pad, N_out=N_out,
        tk=tk, vmem_cap=int(vmem_cap),
        compute_dtype=compute_dtype,
    )


def _vmem_need(p, tm, tk, nbuf_const):
    """Explicit VMEM plan (bytes) for given tiles / constant-buffer count."""
    isz = jnp.dtype(p["compute_dtype"]).itemsize
    need = 2 * tm * tk * isz                              # x tiles (double-buffered)
    need += 2 * tk * p["D_feat_pad"] * isz                # W1^T K-tiles (double-buffered)
    need += nbuf_const * 8 * p["D_feat_pad"] * 4          # b1 (sublane-padded)
    need += nbuf_const * p["D_feat_pad"] * p["N_out"] * isz   # fused head weight
    need += nbuf_const * 8 * p["N_out"] * 4               # fused head bias
    if p["use_gram"]:
        need += nbuf_const * p["D_res_pad"] * p["D_res_pad"] * 4
    need += 2 * tm * p["C_out"] * 4                       # output slab
    need += tm * p["D_feat_pad"] * 4                      # f32 accumulator scratch
    return need


def vim_forward(x_nchw, params):
    """Returns (logits [B, C], sus_score [B])."""
    p = params
    B = int(x_nchw.shape[0])
    cdt = p["compute_dtype"]
    D_in, D_in_pad = p["D_in"], p["D_in_pad"]
    D_feat_pad, N_out = p["D_feat_pad"], p["N_out"]
    C, C_pad, C_out = p["C"], p["C_pad"], p["C_out"]
    vmem_cap = p["vmem_cap"]

    # Row tiling: multiples of 16 (sublane-safe); >=2 row tiles once B >= 32 so the
    # "parallel" axis feeds both v7x TensorCores; 128/256-row tiles at large B so
    # W1^T is re-streamed from HBM as few times as possible.
    if B >= 512:
        tm = 256
    elif B >= 256:
        tm = 128
    elif B >= 32:
        tm = _round_up((B + 1) // 2, 16)
    else:
        tm = _round_up(max(B, 1), 16)
    tk = p["tk"]

    # Shrink tiles until the VMEM plan fits (never silently clamp below the need).
    nbuf_plan = 1 if _FEATURES["single_buffer_consts"] else 2
    while _vmem_need(p, tm, tk, nbuf_plan) > vmem_cap:
        if tk > 128 and tk % 256 == 0 and D_in_pad % (tk // 2) == 0:
            tk //= 2
        elif tm > 16:
            tm = max(16, tm // 2)
        else:
            raise ValueError(
                "ViM kernel does not fit in VMEM even at minimal tiles: need "
                f"{_vmem_need(p, tm, tk, nbuf_plan)} B > cap {vmem_cap} B.")

    B_pad = _round_up(B, tm)
    grid = (B_pad // tm, D_in_pad // tk)

    # TODO(synk): produce/store x in compute_dtype upstream (and B/D_in already
    # tile-aligned) to skip this wrapper-side cast/pad round trip over x.
    x = jnp.asarray(x_nchw).reshape(B, -1)
    if x.dtype != cdt:
        x = x.astype(cdt)
    if B_pad != B or D_in_pad != D_in:
        x = jnp.pad(x, ((0, B_pad - B), (0, D_in_pad - D_in)))

    kernel = functools.partial(
        vim_kernel, alpha=p["alpha"], num_classes=C, c_pad=C_pad, c_out=C_out,
        use_gram=p["use_gram"])

    def _const_spec(shape, single_buffer):
        idx = lambda i, k: (0,) * len(shape)
        if single_buffer:
            # Grid-invariant input: one resident copy, no wasted double buffer.
            return pl.BlockSpec(shape, idx, pipeline_mode=pl.Buffered(1))
        return pl.BlockSpec(shape, idx)

    def _call(single_buffer):
        nbuf = 1 if single_buffer else 2
        need = _vmem_need(p, tm, tk, nbuf)
        vmem_limit = int(min(need + (4 << 20), vmem_cap))
        in_specs = [
            pl.BlockSpec((tm, tk), lambda i, k: (i, k)),            # x tile
            pl.BlockSpec((tk, D_feat_pad), lambda i, k: (k, 0)),    # W1^T K-tile
            _const_spec((1, D_feat_pad), single_buffer),            # b1
            _const_spec((D_feat_pad, N_out), single_buffer),        # fused head weight
            _const_spec((1, N_out), single_buffer),                 # fused head bias
        ]
        args = [x, p["w1t"], p["b1"], p["wf"], p["bias_f"]]
        if p["use_gram"]:
            in_specs.append(_const_spec((p["D_res_pad"], p["D_res_pad"]),
                                        single_buffer))             # G = R^T R
            args.append(p["G"])
        return pl.pallas_call(
            kernel,
            out_shape=jax.ShapeDtypeStruct((B_pad, C_out), jnp.float32),
            grid_spec=pltpu.PrefetchScalarGridSpec(
                num_scalar_prefetch=0,
                grid=grid,
                in_specs=in_specs,
                out_specs=pl.BlockSpec((tm, C_out), lambda i, k: (i, 0)),
                scratch_shapes=[pltpu.VMEM((tm, D_feat_pad), jnp.float32)],
            ),
            compiler_params=pltpu.CompilerParams(
                dimension_semantics=("parallel", "arbitrary"),
                vmem_limit_bytes=vmem_limit),
        )(*args)

    out = None
    if _FEATURES["single_buffer_consts"]:
        try:
            out = _call(True)
        except Exception:
            # This build rejects Buffered(1); fall back to default double-buffering.
            _FEATURES["single_buffer_consts"] = False
            out = None
    if out is None:
        out = _call(False)

    logits = out[:B, :C]
    score = out[:B, C]
    return logits, score


def reference_forward(x_nchw, w1, b1, fc_w, fc_b, R, alpha):
    x = np.asarray(x_nchw, np.float32).reshape(x_nchw.shape[0], -1)
    w1 = np.asarray(w1, np.float32)
    b1 = np.asarray(b1, np.float32)
    fc_w = np.asarray(fc_w, np.float32)
    fc_b = np.asarray(fc_b, np.float32)
    R = np.asarray(R, np.float32)
    u = -np.matmul(np.linalg.pinv(fc_w), fc_b)
    h = np.maximum(x @ w1.T + b1, 0.0)
    logits = h @ fc_w.T + fc_b
    f = h - u
    x_p_t = (R @ R.T @ f.T).T
    vlogit = np.sqrt(np.sum(x_p_t ** 2, axis=-1)) * alpha
    m = logits.max(axis=-1)
    energy = -(m + np.log(np.exp(logits - m[:, None]).sum(axis=-1)))
    return logits, vlogit + energy


if __name__ == "__main__":
    B, C_in, H, W = 2, 4, 16, 16
    D_in = C_in * H * W          # 1024
    D_feat = 64                  # fc-input ("feature") dimension
    NUM_CLASSES = 16
    D_res = 16                   # residual-subspace rank of R
    ALPHA = 0.5

    key = jax.random.PRNGKey(0)
    kx, kw1, kb1, kfw, kfb, kr = jax.random.split(key, 6)

    x = jax.random.normal(kx, (B, C_in, H, W), dtype=jnp.float32)

    # Deterministic synthetic parameters (no checkpoint loading).
    w1 = jax.random.normal(kw1, (D_feat, D_in), dtype=jnp.float32) * 0.05
    b1 = jax.random.normal(kb1, (D_feat,), dtype=jnp.float32) * 0.1
    fc_w = jax.random.normal(kfw, (NUM_CLASSES, D_feat), dtype=jnp.float32) * 0.1
    fc_b = jax.random.normal(kfb, (NUM_CLASSES,), dtype=jnp.float32) * 0.1

    # R: orthonormal basis of a (synthetic) residual subspace, shape (D_feat, D_res).
    rnd = np.asarray(jax.random.normal(kr, (D_feat, D_feat), dtype=jnp.float32))
    q, _ = np.linalg.qr(rnd.astype(np.float64))
    R = np.ascontiguousarray(q[:, :D_res]).astype(np.float32)

    # --- f32 path, orthonormal R (Gram dropped), forced 2 K-tiles: tight check ---
    ref_logits, ref_score = reference_forward(
        np.asarray(x), np.asarray(w1), np.asarray(b1),
        np.asarray(fc_w), np.asarray(fc_b), R, ALPHA)
    params = prepare_vim_params(w1, b1, fc_w, fc_b, R, ALPHA, tk=512)
    logits, sus_score = vim_forward(x, params)
    jax.block_until_ready((logits, sus_score))
    np.testing.assert_allclose(np.asarray(logits), ref_logits, rtol=1e-4, atol=1e-4)
    np.testing.assert_allclose(np.asarray(sus_score), ref_score, rtol=1e-4, atol=5e-4)

    # --- f32 path, non-orthonormal R: exercises the Gram-matrix branch ---
    R2 = (1.3 * R).astype(np.float32)
    ref_logits2, ref_score2 = reference_forward(
        np.asarray(x), np.asarray(w1), np.asarray(b1),
        np.asarray(fc_w), np.asarray(fc_b), R2, ALPHA)
    params2 = prepare_vim_params(w1, b1, fc_w, fc_b, R2, ALPHA)
    assert params2["use_gram"]
    logits2, score2 = vim_forward(x, params2)
    jax.block_until_ready((logits2, score2))
    np.testing.assert_allclose(np.asarray(logits2), ref_logits2, rtol=1e-4, atol=1e-4)
    np.testing.assert_allclose(np.asarray(score2), ref_score2, rtol=1e-4, atol=5e-4)

    # --- bf16 weight/activation path (MXU fast path, f32 accumulation): loose check ---
    params_bf16 = prepare_vim_params(w1, b1, fc_w, fc_b, R, ALPHA, tk=512,
                                     compute_dtype=jnp.bfloat16)
    logits16, score16 = vim_forward(x, params_bf16)
    jax.block_until_ready((logits16, score16))
    np.testing.assert_allclose(np.asarray(logits16), ref_logits, rtol=5e-2, atol=5e-2)
    assert np.all(np.isfinite(np.asarray(score16)))

    print("KERNEL_OK")
</pallas_src>

<mosaic_0001>
module attributes {stable_mosaic.version = 11 : i64} {
  func.func @vim_kernel(%arg0: i32, %arg1: i32, %arg2: memref<16x512xf32, #tpu.memory_space<vmem>>, %arg3: memref<512x128xf32, #tpu.memory_space<vmem>>, %arg4: memref<1x128xf32, #tpu.memory_space<vmem>>, %arg5: memref<128x256xf32, #tpu.memory_space<vmem>>, %arg6: memref<1x256xf32, #tpu.memory_space<vmem>>, %arg7: memref<16x128xf32, #tpu.memory_space<vmem>>, %arg8: memref<16x128xf32, #tpu.memory_space<vmem>>) attributes {dimension_semantics = [#tpu.dimension_semantics<parallel>, #tpu.dimension_semantics<arbitrary>], iteration_bounds = array<i64: 1, 2>, scalar_prefetch = 0 : i64, scratch_operands = 1 : i64, tpu.core_type = #tpu.core_type<tc>, window_params = [{transform_indices = @transform_0, window_bounds = array<i64: 16, 512>}, {transform_indices = @transform_1, window_bounds = array<i64: 512, 128>}, {pipeline_mode = #tpu.pipeline_mode<synchronous>, transform_indices = @transform_2, window_bounds = array<i64: 1, 128>}, {pipeline_mode = #tpu.pipeline_mode<synchronous>, transform_indices = @transform_3, window_bounds = array<i64: 128, 256>}, {pipeline_mode = #tpu.pipeline_mode<synchronous>, transform_indices = @transform_4, window_bounds = array<i64: 1, 256>}, {transform_indices = @transform_5, window_bounds = array<i64: 16, 128>}]} {
    %c0_i32 = arith.constant 0 : i32
    %0 = arith.cmpi eq, %arg1, %c0_i32 : i32
    %1 = arith.extui %0 : i1 to i32
    %c0_i32_0 = arith.constant 0 : i32
    %2 = arith.cmpi ne, %1, %c0_i32_0 : i32
    scf.if %2 {
      %cst_9 = arith.constant 0.000000e+00 : f32
      %12 = vector.broadcast %cst_9 : f32 to vector<16x128xf32>
      %c0_10 = arith.constant 0 : index
      %c0_11 = arith.constant 0 : index
      %13 = vector.load %arg8[%c0_10, %c0_11] : memref<16x128xf32, #tpu.memory_space<vmem>>, vector<16x128xf32>
      tpu.vector_store %arg8[%c0_10, %c0_11], %12 {strides = array<i32>} : memref<16x128xf32, #tpu.memory_space<vmem>>, vector<16x128xf32>,
    } else {
    }
    %c0 = arith.constant 0 : index
    %c0_1 = arith.constant 0 : index
    %3 = vector.load %arg8[%c0, %c0_1] : memref<16x128xf32, #tpu.memory_space<vmem>>, vector<16x128xf32>
    %c0_2 = arith.constant 0 : index
    %c0_3 = arith.constant 0 : index
    %4 = vector.load %arg2[%c0_2, %c0_3] : memref<16x512xf32, #tpu.memory_space<vmem>>, vector<16x512xf32>
    %c0_4 = arith.constant 0 : index
    %c0_5 = arith.constant 0 : index
    %5 = vector.load %arg3[%c0_4, %c0_5] : memref<512x128xf32, #tpu.memory_space<vmem>>, vector<512x128xf32>
    %cst = arith.constant dense<0.000000e+00> : vector<16x128xf32>
    %6 = tpu.matmul %4, %5, %cst {dimension_numbers = #tpu.dot_dimension_numbers<[1], [0], [0], [1], [0, 0, 1, 1], [], []>} : vector<16x512xf32>, vector<512x128xf32>, vector<16x128xf32> -> vector<16x128xf32>
    %7 = arith.addf %3, %6 : vector<16x128xf32>
    %c0_6 = arith.constant 0 : index
    %c0_7 = arith.constant 0 : index
    %8 = vector.load %arg8[%c0_6, %c0_7] : memref<16x128xf32, #tpu.memory_space<vmem>>, vector<16x128xf32>
    tpu.vector_store %arg8[%c0_6, %c0_7], %7 {strides = array<i32>} : memref<16x128xf32, #tpu.memory_space<vmem>>, vector<16x128xf32>,
    %c1_i32 = arith.constant 1 : i32
    %9 = arith.cmpi eq, %arg1, %c1_i32 : i32
    %10 = arith.extui %9 : i1 to i32
    %c0_i32_8 = arith.constant 0 : i32
    %11 = arith.cmpi ne, %10, %c0_i32_8 : i32
    scf.if %11 {
      %c0_9 = arith.constant 0 : index
      %c0_10 = arith.constant 0 : index
      %12 = vector.load %arg8[%c0_9, %c0_10] : memref<16x128xf32, #tpu.memory_space<vmem>>, vector<16x128xf32>
      %c0_11 = arith.constant 0 : index
      %c0_12 = arith.constant 0 : index
      %13 = vector.load %arg4[%c0_11, %c0_12] : memref<1x128xf32, #tpu.memory_space<vmem>>, vector<1x128xf32>
      %14 = vector.broadcast %13 : vector<1x128xf32> to vector<16x128xf32>
      %15 = arith.addf %12, %14 : vector<16x128xf32>
      %cst_13 = arith.constant 0.000000e+00 : f32
      %16 = vector.broadcast %cst_13 : f32 to vector<16x128xf32>
      %17 = arith.maximumf %15, %16 : vector<16x128xf32>
      %c0_14 = arith.constant 0 : index
      %c0_15 = arith.constant 0 : index
      %18 = vector.load %arg5[%c0_14, %c0_15] : memref<128x256xf32, #tpu.memory_space<vmem>>, vector<128x256xf32>
      %cst_16 = arith.constant dense<0.000000e+00> : vector<16x256xf32>
      %19 = tpu.matmul %17, %18, %cst_16 {dimension_numbers = #tpu.dot_dimension_numbers<[1], [0], [0], [1], [0, 0, 1, 1], [], []>} : vector<16x128xf32>, vector<128x256xf32>, vector<16x256xf32> -> vector<16x256xf32>
      %c0_17 = arith.constant 0 : index
      %c0_18 = arith.constant 0 : index
      %20 = vector.load %arg6[%c0_17, %c0_18] : memref<1x256xf32, #tpu.memory_space<vmem>>, vector<1x256xf32>
      %21 = vector.broadcast %20 : vector<1x256xf32> to vector<16x256xf32>
      %22 = arith.addf %19, %21 : vector<16x256xf32>
      %23 = vector.extract_strided_slice %22 {offsets = [0, 0], sizes = [16, 128], strides = [1, 1]} : vector<16x256xf32> to vector<16x128xf32>
      %24 = vector.extract_strided_slice %22 {offsets = [0, 128], sizes = [16, 128], strides = [1, 1]} : vector<16x256xf32> to vector<16x128xf32>
      %25 = arith.mulf %24, %24 : vector<16x128xf32>
      %cst_19 = arith.constant dense<0.000000e+00> : vector<16xf32>
      %26 = vector.multi_reduction <add>, %25, %cst_19 [1] : vector<16x128xf32> to vector<16xf32>
      %27 = vector.shape_cast %26 : vector<16xf32> to vector<16x1xf32>
      %cst_20 = arith.constant 0.000000e+00 : f32
      %28 = vector.broadcast %cst_20 : f32 to vector<16x1xf32>
      %29 = arith.maximumf %27, %28 : vector<16x1xf32>
      %30 = math.sqrt %29 : vector<16x1xf32>
      %cst_21 = arith.constant 5.000000e-01 : f32
      %31 = vector.broadcast %cst_21 : f32 to vector<16x1xf32>
      %32 = arith.mulf %30, %31 : vector<16x1xf32>
      %cst_22 = arith.constant dense<0xFF800000> : vector<16xf32>
      %33 = vector.multi_reduction <maximumf>, %23, %cst_22 [1] : vector<16x128xf32> to vector<16xf32>
      %34 = vector.shape_cast %33 : vector<16xf32> to vector<16x1xf32>
      %35 = vector.broadcast %34 : vector<16x1xf32> to vector<16x128xf32>
      %36 = arith.subf %23, %35 : vector<16x128xf32>
      %37 = math.exp %36 : vector<16x128xf32>
      %cst_23 = arith.constant dense<0.000000e+00> : vector<16xf32>
      %38 = vector.multi_reduction <add>, %37, %cst_23 [1] : vector<16x128xf32> to vector<16xf32>
      %39 = vector.shape_cast %38 : vector<16xf32> to vector<16x1xf32>
      %40 = math.log %39 : vector<16x1xf32>
      %41 = arith.addf %34, %40 : vector<16x1xf32>
      %cst_24 = arith.constant 0.000000e+00 : f32
      %42 = vector.broadcast %cst_24 : f32 to vector<16x1xf32>
      %43 = arith.subf %42, %41 : vector<16x1xf32>
      %44 = arith.addf %32, %43 : vector<16x1xf32>
      %45 = tpu.iota {dimensions = array<i32: 1>} : vector<16x128xi32>
      %c16_i32 = arith.constant 16 : i32
      %46 = vector.broadcast %c16_i32 : i32 to vector<16x128xi32>
      %47 = arith.cmpi slt, %45, %46 : vector<16x128xi32>
      %48 = vector.extract_strided_slice %22 {offsets = [0, 0], sizes = [16, 128], strides = [1, 1]} : vector<16x256xf32> to vector<16x128xf32>
      %c16_i32_25 = arith.constant 16 : i32
      %49 = vector.broadcast %c16_i32_25 : i32 to vector<16x128xi32>
      %50 = arith.cmpi eq, %45, %49 : vector<16x128xi32>
      %cst_26 = arith.constant 0.000000e+00 : f32
      %51 = vector.shape_cast %44 : vector<16x1xf32> to vector<16x1xf32>
      %52 = vector.broadcast %51 : vector<16x1xf32> to vector<16x128xf32>
      %53 = vector.broadcast %cst_26 : f32 to vector<16x128xf32>
      %54 = arith.select %50, %52, %53 : vector<16x128xi1>, vector<16x128xf32>
      %55 = arith.select %47, %48, %54 : vector<16x128xi1>, vector<16x128xf32>
      %c0_27 = arith.constant 0 : index
      %c0_28 = arith.constant 0 : index
      %56 = vector.load %arg7[%c0_27, %c0_28] : memref<16x128xf32, #tpu.memory_space<vmem>>, vector<16x128xf32>
      tpu.vector_store %arg7[%c0_27, %c0_28], %55 {strides = array<i32>} : memref<16x128xf32, #tpu.memory_space<vmem>>, vector<16x128xf32>,
    } else {
    }
    return
  }
  func.func @transform_0(%arg0: i32, %arg1: i32) -> (i32, i32) {
    %c0_i32 = arith.constant 0 : i32
    return %arg0, %arg1 : i32, i32
  }
  func.func @transform_1(%arg0: i32, %arg1: i32) -> (i32, i32) {
    %c0_i32 = arith.constant 0 : i32
    %c0_i32_0 = arith.constant 0 : i32
    return %arg1, %c0_i32 : i32, i32
  }
  func.func @transform_2(%arg0: i32, %arg1: i32) -> (i32, i32) {
    %c0_i32 = arith.constant 0 : i32
    %c0_i32_0 = arith.constant 0 : i32
    %c0_i32_1 = arith.constant 0 : i32
    return %c0_i32, %c0_i32_0 : i32, i32
  }
  func.func @transform_3(%arg0: i32, %arg1: i32) -> (i32, i32) {
    %c0_i32 = arith.constant 0 : i32
    %c0_i32_0 = arith.constant 0 : i32
    %c0_i32_1 = arith.constant 0 : i32
    return %c0_i32, %c0_i32_0 : i32, i32
  }
  func.func @transform_4(%arg0: i32, %arg1: i32) -> (i32, i32) {
    %c0_i32 = arith.constant 0 : i32
    %c0_i32_0 = arith.constant 0 : i32
    %c0_i32_1 = arith.constant 0 : i32
    return %c0_i32, %c0_i32_0 : i32, i32
  }
  func.func @transform_5(%arg0: i32, %arg1: i32) -> (i32, i32) {
    %c0_i32 = arith.constant 0 : i32
    %c0_i32_0 = arith.constant 0 : i32
    return %arg0, %c0_i32 : i32, i32
  }
}

module attributes {stable_mosaic.version = 11 : i64} {
  func.func @vim_kernel(%arg0: i32, %arg1: i32, %arg2: memref<16x512xf32, #tpu.memory_space<vmem>>, %arg3: memref<512x128xf32, #tpu.memory_space<vmem>>, %arg4: memref<1x128xf32, #tpu.memory_space<vmem>>, %arg5: memref<128x256xf32, #tpu.memory_space<vmem>>, %arg6: memref<1x256xf32, #tpu.memory_space<vmem>>, %arg7: memref<16x128xf32, #tpu.memory_space<vmem>>, %arg8: memref<16x128xf32, #tpu.memory_space<vmem>>) attributes {dimension_semantics = [#tpu.dimension_semantics<parallel>, #tpu.dimension_semantics<arbitrary>], iteration_bounds = array<i64: 1, 2>, scalar_prefetch = 0 : i64, scratch_operands = 1 : i64, tpu.core_type = #tpu.core_type<tc>, window_params = [{transform_indices = @transform_0, window_bounds = array<i64: 16, 512>}, {transform_indices = @transform_1, window_bounds = array<i64: 512, 128>}, {pipeline_mode = #tpu.pipeline_mode<synchronous>, transform_indices = @transform_2, window_bounds = array<i64: 1, 128>}, {pipeline_mode = #tpu.pipeline_mode<synchronous>, transform_indices = @transform_3, window_bounds = array<i64: 128, 256>}, {pipeline_mode = #tpu.pipeline_mode<synchronous>, transform_indices = @transform_4, window_bounds = array<i64: 1, 256>}, {transform_indices = @transform_5, window_bounds = array<i64: 16, 128>}]} {
    %c0_i32 = arith.constant 0 : i32
    %0 = arith.cmpi eq, %arg1, %c0_i32 : i32
    %1 = arith.extui %0 : i1 to i32
    %c0_i32_0 = arith.constant 0 : i32
    %2 = arith.cmpi ne, %1, %c0_i32_0 : i32
    scf.if %2 {
      %cst_9 = arith.constant 0.000000e+00 : f32
      %12 = vector.broadcast %cst_9 : f32 to vector<16x128xf32>
      %c0_10 = arith.constant 0 : index
      %c0_11 = arith.constant 0 : index
      %13 = vector.load %arg8[%c0_10, %c0_11] : memref<16x128xf32, #tpu.memory_space<vmem>>, vector<16x128xf32>
      tpu.vector_store %arg8[%c0_10, %c0_11], %12 {strides = array<i32>} : memref<16x128xf32, #tpu.memory_space<vmem>>, vector<16x128xf32>,
    } else {
    }
    %c0 = arith.constant 0 : index
    %c0_1 = arith.constant 0 : index
    %3 = vector.load %arg8[%c0, %c0_1] : memref<16x128xf32, #tpu.memory_space<vmem>>, vector<16x128xf32>
    %c0_2 = arith.constant 0 : index
    %c0_3 = arith.constant 0 : index
    %4 = vector.load %arg2[%c0_2, %c0_3] : memref<16x512xf32, #tpu.memory_space<vmem>>, vector<16x512xf32>
    %c0_4 = arith.constant 0 : index
    %c0_5 = arith.constant 0 : index
    %5 = vector.load %arg3[%c0_4, %c0_5] : memref<512x128xf32, #tpu.memory_space<vmem>>, vector<512x128xf32>
    %cst = arith.constant dense<0.000000e+00> : vector<16x128xf32>
    %6 = tpu.matmul %4, %5, %cst {dimension_numbers = #tpu.dot_dimension_numbers<[1], [0], [0], [1], [0, 0, 1, 1], [], []>} : vector<16x512xf32>, vector<512x128xf32>, vector<16x128xf32> -> vector<16x128xf32>
    %7 = arith.addf %3, %6 : vector<16x128xf32>
    %c0_6 = arith.constant 0 : index
    %c0_7 = arith.constant 0 : index
    %8 = vector.load %arg8[%c0_6, %c0_7] : memref<16x128xf32, #tpu.memory_space<vmem>>, vector<16x128xf32>
    tpu.vector_store %arg8[%c0_6, %c0_7], %7 {strides = array<i32>} : memref<16x128xf32, #tpu.memory_space<vmem>>, vector<16x128xf32>,
    %c1_i32 = arith.constant 1 : i32
    %9 = arith.cmpi eq, %arg1, %c1_i32 : i32
    %10 = arith.extui %9 : i1 to i32
    %c0_i32_8 = arith.constant 0 : i32
    %11 = arith.cmpi ne, %10, %c0_i32_8 : i32
    scf.if %11 {
      %c0_9 = arith.constant 0 : index
      %c0_10 = arith.constant 0 : index
      %12 = vector.load %arg8[%c0_9, %c0_10] : memref<16x128xf32, #tpu.memory_space<vmem>>, vector<16x128xf32>
      %c0_11 = arith.constant 0 : index
      %c0_12 = arith.constant 0 : index
      %13 = vector.load %arg4[%c0_11, %c0_12] : memref<1x128xf32, #tpu.memory_space<vmem>>, vector<1x128xf32>
      %14 = vector.broadcast %13 : vector<1x128xf32> to vector<16x128xf32>
      %15 = arith.addf %12, %14 : vector<16x128xf32>
      %cst_13 = arith.constant 0.000000e+00 : f32
      %16 = vector.broadcast %cst_13 : f32 to vector<16x128xf32>
      %17 = arith.maximumf %15, %16 : vector<16x128xf32>
      %c0_14 = arith.constant 0 : index
      %c0_15 = arith.constant 0 : index
      %18 = vector.load %arg5[%c0_14, %c0_15] : memref<128x256xf32, #tpu.memory_space<vmem>>, vector<128x256xf32>
      %cst_16 = arith.constant dense<0.000000e+00> : vector<16x256xf32>
      %19 = tpu.matmul %17, %18, %cst_16 {dimension_numbers = #tpu.dot_dimension_numbers<[1], [0], [0], [1], [0, 0, 1, 1], [], []>} : vector<16x128xf32>, vector<128x256xf32>, vector<16x256xf32> -> vector<16x256xf32>
      %c0_17 = arith.constant 0 : index
      %c0_18 = arith.constant 0 : index
      %20 = vector.load %arg6[%c0_17, %c0_18] : memref<1x256xf32, #tpu.memory_space<vmem>>, vector<1x256xf32>
      %21 = vector.broadcast %20 : vector<1x256xf32> to vector<16x256xf32>
      %22 = arith.addf %19, %21 : vector<16x256xf32>
      %23 = vector.extract_strided_slice %22 {offsets = [0, 0], sizes = [16, 128], strides = [1, 1]} : vector<16x256xf32> to vector<16x128xf32>
      %24 = vector.extract_strided_slice %22 {offsets = [0, 128], sizes = [16, 128], strides = [1, 1]} : vector<16x256xf32> to vector<16x128xf32>
      %25 = arith.mulf %24, %24 : vector<16x128xf32>
      %cst_19 = arith.constant dense<0.000000e+00> : vector<16xf32>
      %26 = vector.multi_reduction <add>, %25, %cst_19 [1] : vector<16x128xf32> to vector<16xf32>
      %27 = vector.shape_cast %26 : vector<16xf32> to vector<16x1xf32>
      %cst_20 = arith.constant 0.000000e+00 : f32
      %28 = vector.broadcast %cst_20 : f32 to vector<16x1xf32>
      %29 = arith.maximumf %27, %28 : vector<16x1xf32>
      %30 = math.sqrt %29 : vector<16x1xf32>
      %cst_21 = arith.constant 5.000000e-01 : f32
      %31 = vector.broadcast %cst_21 : f32 to vector<16x1xf32>
      %32 = arith.mulf %30, %31 : vector<16x1xf32>
      %cst_22 = arith.constant dense<0xFF800000> : vector<16xf32>
      %33 = vector.multi_reduction <maximumf>, %23, %cst_22 [1] : vector<16x128xf32> to vector<16xf32>
      %34 = vector.shape_cast %33 : vector<16xf32> to vector<16x1xf32>
      %35 = vector.broadcast %34 : vector<16x1xf32> to vector<16x128xf32>
      %36 = arith.subf %23, %35 : vector<16x128xf32>
      %37 = math.exp %36 : vector<16x128xf32>
      %cst_23 = arith.constant dense<0.000000e+00> : vector<16xf32>
      %38 = vector.multi_reduction <add>, %37, %cst_23 [1] : vector<16x128xf32> to vector<16xf32>
      %39 = vector.shape_cast %38 : vector<16xf32> to vector<16x1xf32>
      %40 = math.log %39 : vector<16x1xf32>
      %41 = arith.addf %34, %40 : vector<16x1xf32>
      %cst_24 = arith.constant 0.000000e+00 : f32
      %42 = vector.broadcast %cst_24 : f32 to vector<16x1xf32>
      %43 = arith.subf %42, %41 : vector<16x1xf32>
      %44 = arith.addf %32, %43 : vector<16x1xf32>
      %45 = tpu.iota {dimensions = array<i32: 1>} : vector<16x128xi32>
      %c16_i32 = arith.constant 16 : i32
      %46 = vector.broadcast %c16_i32 : i32 to vector<16x128xi32>
      %47 = arith.cmpi slt, %45, %46 : vector<16x128xi32>
      %48 = vector.extract_strided_slice %22 {offsets = [0, 0], sizes = [16, 128], strides = [1, 1]} : vector<16x256xf32> to vector<16x128xf32>
      %c16_i32_25 = arith.constant 16 : i32
      %49 = vector.broadcast %c16_i32_25 : i32 to vector<16x128xi32>
      %50 = arith.cmpi eq, %45, %49 : vector<16x128xi32>
      %cst_26 = arith.constant 0.000000e+00 : f32
      %51 = vector.shape_cast %44 : vector<16x1xf32> to vector<16x1xf32>
      %52 = vector.broadcast %51 : vector<16x1xf32> to vector<16x128xf32>
      %53 = vector.broadcast %cst_26 : f32 to vector<16x128xf32>
      %54 = arith.select %50, %52, %53 : vector<16x128xi1>, vector<16x128xf32>
      %55 = arith.select %47, %48, %54 : vector<16x128xi1>, vector<16x128xf32>
      %c0_27 = arith.constant 0 : index
      %c0_28 = arith.constant 0 : index
      %56 = vector.load %arg7[%c0_27, %c0_28] : memref<16x128xf32, #tpu.memory_space<vmem>>, vector<16x128xf32>
      tpu.vector_store %arg7[%c0_27, %c0_28], %55 {strides = array<i32>} : memref<16x128xf32, #tpu.memory_space<vmem>>, vector<16x128xf32>,
    } else {
    }
    return
  }
  func.func @transform_0(%arg0: i32, %arg1: i32) -> (i32, i32) {
    %c0_i32 = arith.constant 0 : i32
    return %arg0, %arg1 : i32, i32
  }
  func.func @transform_1(%arg0: i32, %arg1: i32) -> (i32, i32) {
    %c0_i32 = arith.constant 0 : i32
    %c0_i32_0 = arith.constant 0 : i32
    return %arg1, %c0_i32 : i32, i32
  }
  func.func @transform_2(%arg0: i32, %arg1: i32) -> (i32, i32) {
    %c0_i32 = arith.constant 0 : i32
    %c0_i32_0 = arith.constant 0 : i32
    %c0_i32_1 = arith.constant 0 : i32
    return %c0_i32, %c0_i32_0 : i32, i32
  }
  func.func @transform_3(%arg0: i32, %arg1: i32) -> (i32, i32) {
    %c0_i32 = arith.constant 0 : i32
    %c0_i32_0 = arith.constant 0 : i32
    %c0_i32_1 = arith.constant 0 : i32
    return %c0_i32, %c0_i32_0 : i32, i32
  }
  func.func @transform_4(%arg0: i32, %arg1: i32) -> (i32, i32) {
    %c0_i32 = arith.constant 0 : i32
    %c0_i32_0 = arith.constant 0 : i32
    %c0_i32_1 = arith.constant 0 : i32
    return %c0_i32, %c0_i32_0 : i32, i32
  }
  func.func @transform_5(%arg0: i32, %arg1: i32) -> (i32, i32) {
    %c0_i32 = arith.constant 0 : i32
    %c0_i32_0 = arith.constant 0 : i32
    return %arg0, %c0_i32 : i32, i32
  }
}

</mosaic_0001>

<bundles_post_ra>
// kernel: tpu_custom_call.1
= control target key start
LH: loop header
LB: loop body
LE: loop exit
PB: predicated region body
PF: predicated region fallthrough
CT: control target
= control target key end

     0   :  { %s1701_s0 = inlined_call_operand.hbm [shape: f32[16,1024], index: 0, kind: input, shape index: {}]   ;;  %s1702_s1 = inlined_call_operand.hbm [shape: f32[1024,128], index: 1, kind: input, shape index: {}]   ;;  %s1703_s2 = inlined_call_operand.vmem [shape: f32[1,128], index: 2, kind: input, shape index: {}]   ;;  %s1704_s3 = inlined_call_operand.hbm [shape: f32[128,256], index: 3, kind: input, shape index: {}]   ;;  %s1705_s4 = inlined_call_operand.vmem [shape: f32[1,256], index: 4, kind: input, shape index: {}]   ;;  %s1706_s5 = inlined_call_operand.hbm [shape: f32[16,128], index: 5, kind: output, shape index: {}]  }
   0x1   :  { %1712 = sst [smem:[#allocation15_spill]] %s1701_s0 }
   0x2   :  { %1713 = sst [smem:[#allocation16_spill]] %s1704_s3 }
   0x3   :  { %10 = vsyncpa [#allocation4], 0 }
   0x4   :  { %12 = vsyncpa [#allocation4 + $0x1], 0 }
   0x5   :  { %13 = vsyncpa [#allocation7], 0 }
   0x6   :  { %15 = vsyncpa [#allocation7 + $0x1], 0 }
   0x7   :  { %16 = vsyncpa [#allocation5], 0  ;;  %s1384_s18 = smov 0   ;;  %s1386_s19 = smov 0  }
   0x8   :  { %s1388_s20 = smov 0   ;;  %s1390_s21 = smov 0  }
   0x9   :  { %s1392_s22 = smov 0   ;;  %s1394_s23 = smov 0  }
   0xa LB: > { %s1413_s24 = sadd.s32 4294967295, %s1337_s23   ;;  %s43_s25 = sadd.s32 1, %s1325_s20  ;;  %s1337_s23 = sphi %s1394_s23, %s22_s23   ;;  %s1333_s22 = sphi %s1392_s22, %s1732_s22   ;;  %s1329_s21 = sphi %s1390_s21, %s1731_s21   ;;  %s1325_s20 = sphi %s1388_s20, %s1730_s20   ;;  %s1321_s19 = sphi %s1386_s19, %s1729_s19   ;;  %s1317_s18 = sphi %s1384_s18, %s1728_s18  }
   0xb   : > { %p50_p0 = scmp.ne.s32.totalorder %s1325_s20, %s1321_s19  ;;  %p51_p1 = scmp.eq.s32.totalorder %s1337_s23, 0 }
   0xc   : > { %p56_p2 = scmp.ne.s32.totalorder %s1321_s19, %s1317_s18  ;;  %p1707_p3 = scmp.eq.s32.totalorder %s1413_s24, 0 }
   0xd   : > { %p52_p4 = por %p51_p1, %p50_p0  ;;  %p850_p5 = scmp.ge.s32.totalorder %s1337_s23, 1 }
   0xe   : > { %p1424_p6 = por %p1707_p3, %p56_p2  ;;  %p182_p7 = scmp.lt.s32.totalorder %s1337_s23, 3 }
   0xf   : > { %s1339_s28 = smov [#allocation8]   ;;  %p1084_p10 = scmp.lt.s32.totalorder %s1337_s23, 2 }
  0x10   : > { %s1714_s26 = scalar_select %p1424_p6, 1, 0 }
  0x11   : > { %p1429_p8 = pnand %p850_p5, %p182_p7  ;;  %s197_s29 = sshll.u32 %s1339_s28, 4  ;;  %s198_s29 = int_to_ptr.vmem [resolvable:$true] %s197_s29 }
  0x12   : > { %p1442_p12 = pnand %p1084_p10, %p52_p4  ;;  %s31_s7 = sadd.s32 1, %s1333_s22 }
  0x13   : > { %s1715_s27 = scalar_select %p1429_p8, 1, 0 }
  0x14   : > { %p1072_p9 = pneg %p1429_p8  ;;  %s1718_s3 = sld [smem:[#allocation16_spill]] }
  0x15   : > { %s1717_s6 = scalar_select %p1442_p12, 1, 0 }
  0x16   : > { %p1438_p11 = pnand %p1072_p9, %p1707_p3 }
  0x18   : > { %p1163_p0 = pneg %p1438_p11 }
  0x1a   : > { %s1161_s10 = scalar_lea.hbm %s1718_s3, 4096 }
  0x1b   : > { %p1162_p13 = scmp.ne.s32.totalorder %s1718_s3, %s1161_s10  ;;  %p1168_p4 = scmp.lt.u32.totalorder %s1161_s10, %s1718_s3 }
  0x1d   : > { %p1164_p1 = pnand %p1163_p0, %p1162_p13 }
  0x1f   : > { %p1165_p2 = pneg %p1164_p1 }
  0x21   : > { %p1170_p5 = pnand %p1168_p4, %p1165_p2 }
  0x23   : > { %1173 = shalt.err (!%p1170_p5)
}
  0x24   : > { %s1174_s15 = scalar_lea.vmem %s198_s29, 4096  ;;  %p1182_p3 = scmp.lt.s32.totalorder %s198_s29, %s198_s29 }
  0x25   : > { %p1175_p7 = scmp.ne.s32.totalorder %s198_s29, %s1174_s15  ;;  %p1183_p6 = scmp.lt.s32.totalorder %s1174_s15, %s1174_s15 }
  0x27   : > { %p1177_p9 = pnand %p1175_p7, %p1163_p0  ;;  %p1184_p8 = por %p1183_p6, %p1182_p3 }
  0x29   : > { %p1178_p10 = pneg %p1177_p9 }
  0x2b   : > { %p1185_p12 = pnand %p1184_p8, %p1178_p10 }
  0x2d   : > { %1188 = shalt.err (!%p1185_p12)
}
  0x2e   : > { %s1340_s16 = smov 256   ;;  %s1341_s17 = smov 16  }
  0x2f   : > { %1075 = dma.hbm_to_vmem [thread:$0]  (!%p1438_p11), %s1718_s3, 4096, %s198_s29, [#allocation7], %s1340_s16, %s1340_s16, %s1341_s17  }
  0x30   : > { %p32_p13 = scmp.ge.s32.totalorder %s31_s7, 2  ;;  %s1464_s8 = sand.u32 1, %s1325_s20  }
  0x31   : > { %s870_s9 = sshll.u32 %s1333_s22, 9  ;;  %s853_s10 = sshll.u32 %s1464_s8, 6 }
  0x32   : > { %s1734_s7 = smov (%p32_p13, %s31_s7), 0  ;;  %s1720_s0 = sld [smem:[#allocation15_spill]] }
  0x33   : > { %1719 = sst [smem:[#allocation14_spill]] %s1734_s7  ;;  %s39_s11 = ssub.s32 %s1333_s22, %s1734_s7 }
  0x34   : > { %p41_p3 = scmp.eq.s32.totalorder %s39_s11, 0  ;;  %s218_s29 = scalar_lea.vmem [#allocation3], %s853_s10 }
  0x35   : > { %s228_s14 = sshll.u32 %s218_s29, 4  ;;  %s215_s17 = scalar_lea.sflag [#allocation4], %s1464_s8  ;;  %s1482_s14 = int_to_ptr.vmem [resolvable:$true] %s228_s14 }
  0x36   : > { %s1480_s15 = scalar_select %p41_p3, %s1325_s20, %s43_s25  }
  0x37   : > { %p1721_p8 = scmp.ne.s32.totalorder %s1717_s6, 0 }
  0x38   : > { %s1475_s13 = scalar_lea.hbm %s1720_s0, %s870_s9  ;;  %s1194_s10 = scalar_lea.hbm %s1720_s0, 2048 }
  0x39   : > { %s1189_s18 = scalar_lea.hbm %s1475_s13, 1024  ;;  %p1191_p11 = pneg %p1721_p8 }
  0x3a   : > { %p1190_p6 = scmp.ne.s32.totalorder %s1475_s13, %s1189_s18  ;;  %p1195_p1 = scmp.lt.u32.totalorder %s1475_s13, %s1720_s0 }
  0x3b   : > { %p1196_p2 = scmp.lt.u32.totalorder %s1194_s10, %s1189_s18  ;;  %p1198_p5 = scmp.lt.u32.totalorder %s1189_s18, %s1475_s13 }
  0x3c   : > { %p1192_p12 = pnand %p1191_p11, %p1190_p6 }
  0x3d   : > { %p1197_p4 = por %p1196_p2, %p1195_p1 }
  0x3e   : > { %p1193_p0 = pneg %p1192_p12 }
  0x3f   : > { %p1199_p7 = por %p1198_p5, %p1197_p4 }
  0x41   : > { %p1200_p9 = pnand %p1199_p7, %p1193_p0 }
  0x43   : > { %1203 = shalt.err (!%p1200_p9)
}
  0x44   : > { %s1204_s25 = scalar_lea.vmem %s1482_s14, 1024  ;;  %s1342_s30 = smov [#allocation3]  }
  0x45   : > { %p1205_p10 = scmp.ne.s32.totalorder %s1482_s14, %s1204_s25  ;;  %s1209_s29 = sshll.u32 %s1342_s30, 4  ;;  %s1210_s29 = int_to_ptr.vmem [resolvable:$false] %s1209_s29 }
  0x46   : > { %s1211_s28 = scalar_lea.vmem %s1210_s29, 2048  ;;  %p1212_p6 = scmp.lt.s32.totalorder %s1482_s14, %s1210_s29 }
  0x47   : > { %p1207_p13 = pnand %p1205_p10, %p1191_p11  ;;  %p1213_p12 = scmp.lt.s32.totalorder %s1211_s28, %s1204_s25 }
  0x49   : > { %p1208_p3 = pneg %p1207_p13  ;;  %p1214_p1 = por %p1213_p12, %p1212_p6 }
  0x4b   : > { %p1215_p2 = pnand %p1214_p1, %p1208_p3 }
  0x4d   : > { %1218 = shalt.err (!%p1215_p2)
}
  0x4e   : > { %s1343_s18 = smov 1024   ;;  %s1344_s9 = smov 512  }
  0x4f   : > { %s1345_s10 = smov 32   ;;  %s856_s11 = sshll.u32 %s1464_s8, 9 }
  0x50   : > { %1079 = dma.hbm_to_vmem [thread:$0]  (!%p1721_p8), %s1475_s13, 1024, %s1482_s14, %s215_s17, %s1343_s18, %s1344_s9, %s1345_s10  }
  0x51   : > { %s871_s12 = sshll.u32 %s1333_s22, 13  ;;  %s242_s28 = scalar_lea.vmem [#allocation6], %s856_s11 }
  0x52   : > { %s1518_s29 = scalar_lea.hbm %s1702_s1, %s871_s12  ;;  %s249_s16 = sshll.u32 %s242_s28, 4  ;;  %s1520_s16 = int_to_ptr.vmem [resolvable:$true] %s249_s16 }
  0x53   : > { %s1722_s0 = sand.u32 1, %s1337_s23   ;;  %s1219_s7 = scalar_lea.hbm %s1518_s29, 8192 }
  0x54   : > { %s1524_s3 = scalar_lea.sflag [#allocation7], %s1722_s0  ;;  %p1220_p0 = scmp.ne.s32.totalorder %s1518_s29, %s1219_s7 }
  0x55   : > { %s1224_s14 = scalar_lea.hbm %s1702_s1, 16384  ;;  %p1225_p7 = scmp.lt.u32.totalorder %s1518_s29, %s1702_s1 }
  0x56   : > { %p1222_p4 = pnand %p1220_p0, %p1191_p11  ;;  %p1226_p9 = scmp.lt.u32.totalorder %s1224_s14, %s1219_s7 }
  0x57   : > { %p1228_p13 = scmp.lt.u32.totalorder %s1219_s7, %s1518_s29 }
  0x58   : > { %p1223_p5 = pneg %p1222_p4  ;;  %p1227_p10 = por %p1226_p9, %p1225_p7 }
  0x5a   : > { %p1229_p3 = por %p1228_p13, %p1227_p10 }
  0x5c   : > { %p1230_p6 = pnand %p1229_p3, %p1223_p5 }
  0x5e   : > { %1233 = shalt.err (!%p1230_p6)
}
  0x5f   : > { %s1234_s0 = scalar_lea.vmem %s1520_s16, 8192  ;;  %s1346_s9 = smov [#allocation6]  }
  0x60   : > { %p1235_p12 = scmp.ne.s32.totalorder %s1520_s16, %s1234_s0  ;;  %s1239_s10 = sshll.u32 %s1346_s9, 4  ;;  %s1240_s10 = int_to_ptr.vmem [resolvable:$false] %s1239_s10 }
  0x61   : > { %s1241_s11 = scalar_lea.vmem %s1240_s10, 16384  ;;  %p1242_p0 = scmp.lt.s32.totalorder %s1520_s16, %s1240_s10 }
  0x62   : > { %p1237_p1 = pnand %p1235_p12, %p1191_p11  ;;  %p1243_p4 = scmp.lt.s32.totalorder %s1241_s11, %s1234_s0 }
  0x64   : > { %p1238_p2 = pneg %p1237_p1  ;;  %p1244_p7 = por %p1243_p4, %p1242_p0 }
  0x66   : > { %p1245_p9 = pnand %p1244_p7, %p1238_p2 }
  0x68   : > { %1248 = shalt.err (!%p1245_p9)
}
  0x69   : > { %s1347_s7 = smov 128   ;;  %s1348_s12 = smov 8  }
  0x6a   : > { %1082 = dma.hbm_to_vmem [thread:$0]  (!%p1721_p8), %s1518_s29, 8192, %s1520_s16, %s1524_s3, %s1347_s7, %s1347_s7, %s1348_s12  }
  0x6b   : > { %p1723_p11 = scmp.ne.s32.totalorder %s1715_s27, 0 }
  0x6c   : > { %s263_s25 = sand.u32 (!%p1723_p11), 1, %s1321_s19   ;;  %p1724_p5 = scmp.ne.s32.totalorder (!%p1723_p11), %s1714_s26, 0 }
  0x6d   : > { %261 = sbr.rel (%p1723_p11) target bundleno = 965 (0x3c5), region = 40  ;;  %s860_s30 = sshll.u32 (!%p1723_p11), %s263_s25, 6 }
  0x6e   : > { %s264_s28 = scalar_lea.sflag (!%p1723_p11), [#allocation4], %s263_s25  ;;  %s1553_s8 = scalar_lea.vmem (!%p1723_p11), [#allocation3], %s860_s30 }
  0x74   : > { %1300 = dma.done.wait (%p1724_p5), %s264_s28, 1024  }
  0x75   : > { %1302 = vsyncadd (%p1724_p5), %s264_s28, 4294966272  ;;  %s272_s13 = sand.u32 1, %s1413_s24   ;;  %s861_s6 = sshll.u32 %s263_s25, 9 }
  0x76   : > { %s273_s3 = scalar_lea.sflag [#allocation7], %s272_s13  ;;  %s1560_s16 = scalar_lea.vmem [#allocation6], %s861_s6 }
  0x77   : > { %1304 = dma.done.wait (%p1724_p5), %s273_s3, 8192  }
  0x78   : > { %1306 = vsyncadd (%p1724_p5), %s273_s3, 4294959104  ;;  %p1725_p8 = scmp.eq.s32.totalorder %s1413_s24, 0 }
  0x7a   : > { %1308 = dma.done.wait (%p1725_p8), [#allocation7], 4096   ;;  %p1726_p10 = pmov %p1725_p8 }
  0x7b   : > { %p863_p13 = scmp.ne.s32.totalorder %s1329_s21, 0 }
  0x7c   : > { %1310 = vsyncadd (%p1726_p10), [#allocation7], 4294963200  ;;  %v1349_v0 = vmov (!%p863_p13), 0.0  }
  0x7d   : > { %314 = sbr.rel (%p863_p13) target bundleno = 132 (0x84), region = 56  ;;  %315 = vst [vmem:[#allocation2] sm:$0xff] (!%p863_p13), %v1349_v0  ;;  %316 = vst [vmem:[#allocation2 + $0x8] sm:$0xff] (!%p863_p13), %v1349_v0 }
  0x84 PF: > { %v343_v1 = vld [vmem:[%s1560_s16 + $0x80] sm:$0xff]  ;;  %v344_v2 = vld [vmem:[%s1560_s16 + $0x88] sm:$0xff]  ;;  %v345_v12 = vld [vmem:[%s1560_s16 + $0x90] sm:$0xff]  ;;  %p864_p3 = scmp.ne.s32.totalorder %s1329_s21, 1 }
  0x85   : > { %v375_v3 = vld [vmem:[%s1560_s16 + $0x180] sm:$0xff]  ;;  %v948_v4 = vpack.c.bf16 %v344_v2, %v343_v1  ;;  %v376_v5 = vld [vmem:[%s1560_s16 + $0x188] sm:$0xff]  ;;  %v346_v14 = vld [vmem:[%s1560_s16 + $0x98] sm:$0xff] }
  0x86   : > { %v327_v6 = vld [vmem:[%s1560_s16] sm:$0xff]  ;;  %v328_v7 = vld [vmem:[%s1560_s16 + $0x8] sm:$0xff]  ;;  %v980_v8 = vpack.c.bf16 %v376_v5, %v375_v3  ;;  %v377_v15 = vld [vmem:[%s1560_s16 + $0x190] sm:$0xff]  ;;  %v952_v17 = vpack.c.bf16 %v346_v14, %v345_v12 }
  0x87   : > { %v950_v9 = vpack.c.bf16 %v328_v7, %v327_v6  ;;  %v359_v10 = vld [vmem:[%s1560_s16 + $0x100] sm:$0xff]  ;;  %v360_v11 = vld [vmem:[%s1560_s16 + $0x108] sm:$0xff]  ;;  %949 = vmatprep.subr.bf16.mxu0 %v948_v4  ;;  %v378_v16 = vld [vmem:[%s1560_s16 + $0x198] sm:$0xff] }
  0x88   : > { %v982_v13 = vpack.c.bf16 %v360_v11, %v359_v10  ;;  %981 = vmatprep.subr.bf16.mxu1 %v980_v8  ;;  %v984_v18 = vpack.c.bf16 %v378_v16, %v377_v15  ;;  %v329_v19 = vld [vmem:[%s1560_s16 + $0x10] sm:$0xff]  ;;  %v330_v20 = vld [vmem:[%s1560_s16 + $0x18] sm:$0xff]  ;;  %v347_v24 = vld [vmem:[%s1560_s16 + $0xa0] sm:$0xff] }
  0x89   : > { %951 = vmatpush3.bf16.msra.mxu0 %v950_v9  ;;  %v361_v21 = vld [vmem:[%s1560_s16 + $0x110] sm:$0xff]  ;;  %v954_v22 = vpack.c.bf16 %v330_v20, %v329_v19  ;;  %v362_v23 = vld [vmem:[%s1560_s16 + $0x118] sm:$0xff]  ;;  %v348_v25 = vld [vmem:[%s1560_s16 + $0xa8] sm:$0xff] }
  0x8a   : > { %983 = vmatpush3.bf16.msra.mxu1 %v982_v13  ;;  %953 = vmatprep.subr.bf16.mxu0 %v952_v17  ;;  %v986_v26 = vpack.c.bf16 %v362_v23, %v361_v21  ;;  %v956_v27 = vpack.c.bf16 %v348_v25, %v347_v24  ;;  %v379_v28 = vld [vmem:[%s1560_s16 + $0x1a0] sm:$0xff]  ;;  %v380_v29 = vld [vmem:[%s1560_s16 + $0x1a8] sm:$0xff]  ;;  %v349_v36 = vld [vmem:[%s1560_s16 + $0xb0] sm:$0xff] }
  0x8b   : > { %985 = vmatprep.subr.bf16.mxu1 %v984_v18  ;;  %v331_v30 = vld [vmem:[%s1560_s16 + $0x20] sm:$0xff]  ;;  %v988_v31 = vpack.c.bf16 %v380_v29, %v379_v28  ;;  %v332_v32 = vld [vmem:[%s1560_s16 + $0x28] sm:$0xff]  ;;  %v350_v37 = vld [vmem:[%s1560_s16 + $0xb8] sm:$0xff] }
  0x8c   : > { %v363_v33 = vld [vmem:[%s1560_s16 + $0x120] sm:$0xff]  ;;  %v364_v34 = vld [vmem:[%s1560_s16 + $0x128] sm:$0xff]  ;;  %v958_v35 = vpack.c.bf16 %v332_v32, %v331_v30  ;;  %v381_v38 = vld [vmem:[%s1560_s16 + $0x1b0] sm:$0xff]  ;;  %v960_v40 = vpack.c.bf16 %v350_v37, %v349_v36 }
  0x8d   : > { %955 = vmatpush3.bf16.msra.mxu0 %v954_v22  ;;  %v990_v39 = vpack.c.bf16 %v364_v34, %v363_v33  ;;  %v382_v41 = vld [vmem:[%s1560_s16 + $0x1b8] sm:$0xff]  ;;  %v333_v42 = vld [vmem:[%s1560_s16 + $0x30] sm:$0xff]  ;;  %v351_v47 = vld [vmem:[%s1560_s16 + $0xc0] sm:$0xff] }
  0x8e   : > { %987 = vmatpush3.bf16.msra.mxu1 %v986_v26  ;;  %957 = vmatprep.subr.bf16.mxu0 %v956_v27  ;;  %v334_v43 = vld [vmem:[%s1560_s16 + $0x38] sm:$0xff]  ;;  %v992_v44 = vpack.c.bf16 %v382_v41, %v381_v38  ;;  %v365_v45 = vld [vmem:[%s1560_s16 + $0x130] sm:$0xff]  ;;  %v352_v48 = vld [vmem:[%s1560_s16 + $0xc8] sm:$0xff] }
  0x8f   : > { %989 = vmatprep.subr.bf16.mxu1 %v988_v31  ;;  %v366_v46 = vld [vmem:[%s1560_s16 + $0x138] sm:$0xff]  ;;  %v383_v49 = vld [vmem:[%s1560_s16 + $0x1c0] sm:$0xff]  ;;  %v384_v50 = vld [vmem:[%s1560_s16 + $0x1c8] sm:$0xff]  ;;  %v962_v51 = vpack.c.bf16 %v334_v43, %v333_v42  ;;  %v964_v53 = vpack.c.bf16 %v352_v48, %v351_v47 }
  0x90   : > { %v994_v52 = vpack.c.bf16 %v366_v46, %v365_v45  ;;  %v335_v54 = vld [vmem:[%s1560_s16 + $0x40] sm:$0xff]  ;;  %v336_v55 = vld [vmem:[%s1560_s16 + $0x48] sm:$0xff]  ;;  %v996_v57 = vpack.c.bf16 %v384_v50, %v383_v49  ;;  %v353_v59 = vld [vmem:[%s1560_s16 + $0xd0] sm:$0xff] }
  0x91   : > { %959 = vmatpush3.bf16.msra.mxu0 %v958_v35  ;;  %v367_v56 = vld [vmem:[%s1560_s16 + $0x140] sm:$0xff]  ;;  %v368_v58 = vld [vmem:[%s1560_s16 + $0x148] sm:$0xff]  ;;  %v354_v60 = vld [vmem:[%s1560_s16 + $0xd8] sm:$0xff]  ;;  %v966_v63 = vpack.c.bf16 %v336_v55, %v335_v54 }
  0x92   : > { %991 = vmatpush3.bf16.msra.mxu1 %v990_v39  ;;  %961 = vmatprep.subr.bf16.mxu0 %v960_v40  ;;  %v385_v61 = vld [vmem:[%s1560_s16 + $0x1d0] sm:$0xff]  ;;  %v386_v62 = vld [vmem:[%s1560_s16 + $0x1d8] sm:$0xff]  ;;  %v998_v0 = vpack.c.bf16 %v368_v58, %v367_v56  ;;  %v968_v1 = vpack.c.bf16 %v354_v60, %v353_v59  ;;  %v355_v7 = vld [vmem:[%s1560_s16 + $0xe0] sm:$0xff] }
  0x93   : > { %993 = vmatprep.subr.bf16.mxu1 %v992_v44  ;;  %v337_v2 = vld [vmem:[%s1560_s16 + $0x50] sm:$0xff]  ;;  %v338_v3 = vld [vmem:[%s1560_s16 + $0x58] sm:$0xff]  ;;  %v1000_v5 = vpack.c.bf16 %v386_v62, %v385_v61  ;;  %v356_v8 = vld [vmem:[%s1560_s16 + $0xe8] sm:$0xff] }
  0x94   : > { %v369_v4 = vld [vmem:[%s1560_s16 + $0x150] sm:$0xff]  ;;  %v370_v6 = vld [vmem:[%s1560_s16 + $0x158] sm:$0xff]  ;;  %v387_v9 = vld [vmem:[%s1560_s16 + $0x1e0] sm:$0xff]  ;;  %v970_v11 = vpack.c.bf16 %v338_v3, %v337_v2  ;;  %v972_v15 = vpack.c.bf16 %v356_v8, %v355_v7  ;;  %v1350_v2 = vmov (!%p864_p3), 0.0  }
  0x95   : > { %963 = vmatpush3.bf16.msra.mxu0 %v962_v51  ;;  %v388_v10 = vld [vmem:[%s1560_s16 + $0x1e8] sm:$0xff]  ;;  %v339_v12 = vld [vmem:[%s1560_s16 + $0x60] sm:$0xff]  ;;  %v1002_v14 = vpack.c.bf16 %v370_v6, %v369_v4  ;;  %v322_v18 = vld [vmem:[%s1553_s8 + $0x18] sm:$0xff] }
  0x96   : > { %995 = vmatpush3.bf16.msra.mxu1 %v994_v52  ;;  %965 = vmatprep.subr.bf16.mxu0 %v964_v53  ;;  %v340_v13 = vld [vmem:[%s1560_s16 + $0x68] sm:$0xff]  ;;  %v371_v16 = vld [vmem:[%s1560_s16 + $0x160] sm:$0xff]  ;;  %v1004_v19 = vpack.c.bf16 %v388_v10, %v387_v9  ;;  %v357_v21 = vld [vmem:[%s1560_s16 + $0xf0] sm:$0xff] }
  0x97   : > { %997 = vmatprep.subr.bf16.mxu1 %v996_v57  ;;  %v320_v17 = vld [vmem:[%s1553_s8 + $0x8] sm:$0xff]  ;;  %v358_v22 = vld [vmem:[%s1560_s16 + $0xf8] sm:$0xff]  ;;  %v389_v23 = vld [vmem:[%s1560_s16 + $0x1f0] sm:$0xff]  ;;  %530 = vmatprep.mubr.f32.mxu1 %v322_v18  ;;  %v974_v25 = vpack.c.bf16 %v340_v13, %v339_v12 }
  0x98   : > { %v372_v20 = vld [vmem:[%s1560_s16 + $0x168] sm:$0xff]  ;;  %455 = vmatprep.mubr.f32.mxu0 %v320_v17  ;;  %v390_v24 = vld [vmem:[%s1560_s16 + $0x1f8] sm:$0xff]  ;;  %v976_v27 = vpack.c.bf16 %v358_v22, %v357_v21  ;;  %v341_v28 = vld [vmem:[%s1560_s16 + $0x70] sm:$0xff] }
  0x99   : > { %967 = vmatpush3.bf16.msra.mxu0 %v966_v63  ;;  %v1006_v26 = vpack.c.bf16 %v372_v20, %v371_v16  ;;  %v342_v29 = vld [vmem:[%s1560_s16 + $0x78] sm:$0xff]  ;;  %v1008_v30 = vpack.c.bf16 %v390_v24, %v389_v23  ;;  %v373_v31 = vld [vmem:[%s1560_s16 + $0x170] sm:$0xff]  ;;  %v319_v35 = vld [vmem:[%s1553_s8] sm:$0xff] }
  0x9a   : > { %999 = vmatpush3.bf16.msra.mxu1 %v998_v0  ;;  %969 = vmatprep.subr.bf16.mxu0 %v968_v1  ;;  %v374_v32 = vld [vmem:[%s1560_s16 + $0x178] sm:$0xff]  ;;  %v978_v33 = vpack.c.bf16 %v342_v29, %v341_v28  ;;  %v321_v36 = vld [vmem:[%s1553_s8 + $0x10] sm:$0xff]  ;;  %v324_v37 = vld [vmem:[%s1553_s8 + $0x28] sm:$0xff] }
  0x9b   : > { %1001 = vmatprep.subr.bf16.mxu1 %v1000_v5  ;;  %v1010_v34 = vpack.c.bf16 %v374_v32, %v373_v31  ;;  %v326_v38 = vld [vmem:[%s1553_s8 + $0x38] sm:$0xff]  ;;  %v323_v39 = vld [vmem:[%s1553_s8 + $0x20] sm:$0xff]  ;;  %v325_v40 = vld [vmem:[%s1553_s8 + $0x30] sm:$0xff] }
  0x9c   : > { %v317_v47 = vld [vmem:[#allocation2] sm:$0xff]  ;;  %v318_v56 = vld [vmem:[#allocation2 + $0x8] sm:$0xff]  ;;  %v563_v59 = vld [vmem:[#allocation8 + $0x8] sm:$0xff] (!%p864_p3) }
  0x9d   : > { %971 = vmatpush3.bf16.msra.mxu0 %v970_v11  ;;  %v565_v60 = vld [vmem:[#allocation8 + $0x18] sm:$0xff] (!%p864_p3)  ;;  %v562_v61 = vld [vmem:[#allocation8] sm:$0xff] (!%p864_p3)  ;;  %v564_v63 = vld [vmem:[#allocation8 + $0x10] sm:$0xff] (!%p864_p3) }
  0x9e   : > { %1003 = vmatpush3.bf16.msra.mxu1 %v1002_v14  ;;  %973 = vmatprep.subr.bf16.mxu0 %v972_v15  ;;  %v1012_v62 = vpack.c.bf16 (!%p864_p3), %v565_v60, %v563_v59  ;;  %v567_v0 = vld [vmem:[#allocation8 + $0x28] sm:$0xff] (!%p864_p3)  ;;  %v569_v1 = vld [vmem:[#allocation8 + $0x38] sm:$0xff] (!%p864_p3)  ;;  %v1014_v3 = vpack.c.bf16 (!%p864_p3), %v564_v63, %v562_v61  ;;  %v566_v5 = vld [vmem:[#allocation8 + $0x20] sm:$0xff] (!%p864_p3) }
  0x9f   : > { %1005 = vmatprep.subr.bf16.mxu1 %v1004_v19  ;;  %v1016_v4 = vpack.c.bf16 (!%p864_p3), %v569_v1, %v567_v0  ;;  %v568_v6 = vld [vmem:[#allocation8 + $0x30] sm:$0xff] (!%p864_p3)  ;;  %v571_v7 = vld [vmem:[#allocation8 + $0x48] sm:$0xff] (!%p864_p3)  ;;  %v573_v8 = vld [vmem:[#allocation8 + $0x58] sm:$0xff] (!%p864_p3) }
  0xa0   : > { %v1018_v9 = vpack.c.bf16 (!%p864_p3), %v568_v6, %v566_v5  ;;  %v1020_v10 = vpack.c.bf16 (!%p864_p3), %v573_v8, %v571_v7  ;;  %v570_v11 = vld [vmem:[#allocation8 + $0x40] sm:$0xff] (!%p864_p3)  ;;  %v572_v12 = vld [vmem:[#allocation8 + $0x50] sm:$0xff] (!%p864_p3)  ;;  %v575_v13 = vld [vmem:[#allocation8 + $0x68] sm:$0xff] (!%p864_p3) }
  0xa1   : > { %975 = vmatpush3.bf16.msra.mxu0 %v974_v25  ;;  %v577_v14 = vld [vmem:[#allocation8 + $0x78] sm:$0xff] (!%p864_p3)  ;;  %v1022_v15 = vpack.c.bf16 (!%p864_p3), %v572_v12, %v570_v11  ;;  %v574_v17 = vld [vmem:[#allocation8 + $0x60] sm:$0xff] (!%p864_p3)  ;;  %v576_v18 = vld [vmem:[#allocation8 + $0x70] sm:$0xff] (!%p864_p3) }
  0xa2   : > { %1007 = vmatpush3.bf16.msra.mxu1 %v1006_v26  ;;  %977 = vmatprep.subr.bf16.mxu0 %v976_v27  ;;  %v1024_v16 = vpack.c.bf16 (!%p864_p3), %v577_v14, %v575_v13  ;;  %v579_v19 = vld [vmem:[#allocation8 + $0x88] sm:$0xff] (!%p864_p3)  ;;  %v581_v20 = vld [vmem:[#allocation8 + $0x98] sm:$0xff] (!%p864_p3)  ;;  %v1026_v21 = vpack.c.bf16 (!%p864_p3), %v576_v18, %v574_v17  ;;  %v578_v23 = vld [vmem:[#allocation8 + $0x80] sm:$0xff] (!%p864_p3) }
  0xa3   : > { %1009 = vmatprep.subr.bf16.mxu1 %v1008_v30  ;;  %v1028_v22 = vpack.c.bf16 (!%p864_p3), %v581_v20, %v579_v19  ;;  %v580_v24 = vld [vmem:[#allocation8 + $0x90] sm:$0xff] (!%p864_p3)  ;;  %v583_v25 = vld [vmem:[#allocation8 + $0xa8] sm:$0xff] (!%p864_p3)  ;;  %v585_v26 = vld [vmem:[#allocation8 + $0xb8] sm:$0xff] (!%p864_p3) }
  0xa4   : > { %v1030_v27 = vpack.c.bf16 (!%p864_p3), %v580_v24, %v578_v23  ;;  %v1032_v28 = vpack.c.bf16 (!%p864_p3), %v585_v26, %v583_v25  ;;  %v582_v29 = vld [vmem:[#allocation8 + $0xa0] sm:$0xff] (!%p864_p3)  ;;  %v584_v30 = vld [vmem:[#allocation8 + $0xb0] sm:$0xff] (!%p864_p3)  ;;  %v587_v31 = vld [vmem:[#allocation8 + $0xc8] sm:$0xff] (!%p864_p3) }
  0xa5   : > { %979 = vmatpush3.bf16.msra.mxu0 %v978_v33  ;;  %v589_v32 = vld [vmem:[#allocation8 + $0xd8] sm:$0xff] (!%p864_p3)  ;;  %v1034_v33 = vpack.c.bf16 (!%p864_p3), %v584_v30, %v582_v29 }
  0xa6   : > { %1011 = vmatpush3.bf16.msra.mxu1 %v1010_v34  ;;  %1013 = vmatprep.subr.bf16.mxu0 (!%p864_p3), %v1012_v62  ;;  %v1036_v34 = vpack.c.bf16 (!%p864_p3), %v589_v32, %v587_v31 }
  0xa7   : > { %1044 = vmatprep.subr.bf16.mxu1 (!%p864_p3), %v1012_v62 }
  0xa8   : > { %456 = vmatmul.mubr.f32.vlgmr.msra.gmra.mrb[0].mxu0 %v319_v35  ;;  %v586_v35 = vld [vmem:[#allocation8 + $0xc0] sm:$0xff] (!%p864_p3) }
  0xa9   : > { %531 = vmatmul.mubr.f32.vlgmr.msra.gmra.mrb[0].mxu1 %v321_v36  ;;  %460 = vmatprep.mubr.f32.mxu0 %v324_v37  ;;  %v588_v36 = vld [vmem:[#allocation8 + $0xd0] sm:$0xff] (!%p864_p3)  ;;  %v591_v37 = vld [vmem:[#allocation8 + $0xe8] sm:$0xff] (!%p864_p3) }
  0xaa   : > { %535 = vmatprep.mubr.f32.mxu1 %v326_v38  ;;  %1015 = vmatpush1.bf16.msra.mxu0 (!%p864_p3), %v1014_v3  ;;  %v593_v38 = vld [vmem:[#allocation8 + $0xf8] sm:$0xff] (!%p864_p3) }
  0xab   : > { %1052 = vmatpush1.bf16.msra.mxu1 (!%p864_p3), %v1014_v3  ;;  %1017 = vmatprep.subr.bf16.mxu0 (!%p864_p3), %v1016_v4 }
  0xac   : > { %461 = vmatmul.mubr.f32.gmra.mrb[2].mxu0 %v323_v39  ;;  %1045 = vmatprep.subr.bf16.mxu1 (!%p864_p3), %v1016_v4  ;;  %v1038_v39 = vpack.c.bf16 (!%p864_p3), %v588_v36, %v586_v35 }
  0xad   : > { %536 = vmatmul.mubr.f32.gmra.mrb[2].mxu1 %v325_v40  ;;  %670 = vmatprep.mubr.f32.mxu0 (!%p864_p3), %v1350_v2 }
  0xae   : > { %676 = vmatprep.mubr.f32.mxu1 (!%p864_p3), %v1350_v2  ;;  %1019 = vmatpush1.bf16.msra.mxu0 (!%p864_p3), %v1018_v9 }
  0xaf   : > { %1053 = vmatpush1.bf16.msra.mxu1 (!%p864_p3), %v1018_v9  ;;  %1021 = vmatprep.subr.bf16.mxu0 (!%p864_p3), %v1020_v10 }
  0xb0   : > { %1046 = vmatprep.subr.bf16.mxu1 (!%p864_p3), %v1020_v10 }
  0xb2   : > { %1023 = vmatpush1.bf16.msra.mxu0 (!%p864_p3), %v1022_v15 }
  0xb3   : > { %1054 = vmatpush1.bf16.msra.mxu1 (!%p864_p3), %v1022_v15  ;;  %1025 = vmatprep.subr.bf16.mxu0 (!%p864_p3), %v1024_v16 }
  0xb4   : > { %1047 = vmatprep.subr.bf16.mxu1 (!%p864_p3), %v1024_v16 }
  0xb6   : > { %1027 = vmatpush1.bf16.msra.mxu0 (!%p864_p3), %v1026_v21 }
  0xb7   : > { %1055 = vmatpush1.bf16.msra.mxu1 (!%p864_p3), %v1026_v21  ;;  %1029 = vmatprep.subr.bf16.mxu0 (!%p864_p3), %v1028_v22 }
  0xb8   : > { %1048 = vmatprep.subr.bf16.mxu1 (!%p864_p3), %v1028_v22 }
  0xba   : > { %1031 = vmatpush1.bf16.msra.mxu0 (!%p864_p3), %v1030_v27 }
  0xbb   : > { %1056 = vmatpush1.bf16.msra.mxu1 (!%p864_p3), %v1030_v27  ;;  %1033 = vmatprep.subr.bf16.mxu0 (!%p864_p3), %v1032_v28 }
  0xbc   : > { %1049 = vmatprep.subr.bf16.mxu1 (!%p864_p3), %v1032_v28 }
  0xbe   : > { %1035 = vmatpush1.bf16.msra.mxu0 (!%p864_p3), %v1034_v33 }
  0xbf   : > { %1057 = vmatpush1.bf16.msra.mxu1 (!%p864_p3), %v1034_v33  ;;  %1037 = vmatprep.subr.bf16.mxu0 (!%p864_p3), %v1036_v34 }
  0xc0   : > { %1050 = vmatprep.subr.bf16.mxu1 (!%p864_p3), %v1036_v34 }
  0xc2   : > { %1039 = vmatpush1.bf16.msra.mxu0 (!%p864_p3), %v1038_v39 }
  0xc3   : > { %1058 = vmatpush1.bf16.msra.mxu1 (!%p864_p3), %v1038_v39 }
 0x17b   : > { %v904_v41 = vpop.f32.mrb[0].mxu0 }
 0x17c   : > { %v942_v42 = vpop.f32.mrb[0].mxu1  ;;  %v905_v43 = vpop.f32.mrb[1].mxu0 }
 0x17d   : > { %v906_v44 = vadd.f32 %v905_v43, %v904_v41  ;;  %v943_v45 = vpop.f32.mrb[1].mxu1  ;;  %v865_v41 = vld [vmem:[%s1703_s2] ss:$0 sm:$0xff] (!%p864_p3)  ;;  %v1040_v43 = vpack.c.bf16 (!%p864_p3), %v593_v38, %v591_v37 }
 0x17e   : > { %v944_v46 = vadd.f32 %v943_v45, %v942_v42  ;;  %v592_v45 = vld [vmem:[#allocation8 + $0xf0] sm:$0xff] (!%p864_p3) }
 0x17f   : > { %v907_v48 = vpop.f32.mrb[2].mxu0  ;;  %1041 = vmatprep.subr.bf16.mxu0 (!%p864_p3), %v1040_v43  ;;  %1051 = vmatprep.subr.bf16.mxu1 (!%p864_p3), %v1040_v43 }
 0x180   : > { %v533_v49 = vadd.f32 %v944_v46, %v906_v44  ;;  %v945_v50 = vpop.f32.mrb[2].mxu1  ;;  %v908_v51 = vpop.f32.mrb[3].mxu0  ;;  %v590_v44 = vld [vmem:[#allocation8 + $0xe0] sm:$0xff] (!%p864_p3) }
 0x181   : > { %v909_v52 = vadd.f32 %v908_v51, %v907_v48  ;;  %v946_v53 = vpop.f32.mrb[3].mxu1  ;;  %v1042_v48 = vpack.c.bf16 (!%p864_p3), %v592_v45, %v590_v44  ;;  %v596_v51 = vlaneseq (!%p864_p3) }
 0x182   : > { %v541_v54 = vadd.f32 %v533_v49, %v317_v47  ;;  %v947_v55 = vadd.f32 %v946_v53, %v945_v50  ;;  %548 = sbr.rel (%p864_p3) target bundleno = 939 (0x3ab), region = 60 }
 0x183   : > { %1043 = vmatpush1.bf16.msra.mxu0 (!%p864_p3), %v1042_v48  ;;  %1059 = vmatpush1.bf16.msra.mxu1 (!%p864_p3), %v1042_v48  ;;  %v732_v26 = vand.u32 (!%p864_p3), 127, %v596_v51 }
 0x184   : > { %543 = vst [vmem:[#allocation2] sm:$0xff] %v541_v54  ;;  %v538_v57 = vadd.f32 %v947_v55, %v909_v52  ;;  %v597_v52 = vshrl.u32 (!%p864_p3), %v596_v51, 7  ;;  %v594_v54 = vld [vmem:[%s1705_s4] sm:$0x3] (!%p864_p3) }
 0x185   : > { %vm734_vm4 = vcmp.eq.s32.totalorder (!%p864_p3), %v732_v26, 16  ;;  %vm733_vm5 = vcmp.lt.s32.totalorder (!%p864_p3), %v732_v26, 16 }
 0x186   : > { %v542_v58 = vadd.f32 %v538_v57, %v318_v56  ;;  %v598_v53 = vsub.s32 (!%p864_p3), 0, %v597_v52  ;;  %v602_v55 = vsub.s32 (!%p864_p3), 1, %v597_v52 }
 0x188   : > { %544 = vst [vmem:[#allocation2 + $0x8] sm:$0xff] %v542_v58  ;;  %v599_v56 = vrot.slane (!%p864_p3), %v594_v54, %v598_v53  ;;  %v603_v57 = vrot.slane (!%p864_p3), %v594_v54, %v602_v55 }
 0x18b   : > { %v549_v40 = vld [vmem:[#allocation2] sm:$0xff] }
 0x18c   : > { %v558_v46 = vadd.f32 %v865_v41, %v549_v40 }
 0x18e   : > { %v560_v49 = vmax.f32 %v558_v46, 0.0 }
 0x18f   : > { %v550_v42 = vld [vmem:[#allocation2 + $0x8] sm:$0xff] }
 0x190   : > { %v559_v47 = vadd.f32 %v865_v41, %v550_v42  ;;  %671 = vmatmul.mubr.f32.vlgmr.msra.gmra.mrb[0].mxu0 %v560_v49 }
 0x192   : > { %v561_v50 = vmax.f32 %v559_v47, 0.0 }
 0x194   : > { %677 = vmatmul.mubr.f32.vlgmr.msra.gmra.mrb[0].mxu1 %v561_v50 }
 0x263   : > { %v672_v58 = vpop.f32.mrb[0].mxu0 }
 0x264   : > { %v1650_v60 = vadd.f32 %v672_v58, %v599_v56  ;;  %v674_v61 = vpop.f32.mrb[1].mxu0 }
 0x265   : > { %v675_v0 = vadd.f32 %v674_v61, %v603_v57 }
 0x266   : > { %707 = vmax.xlane.f32.xlu0 %v1650_v60 }
 0x267   : > { %v678_v59 = vpop.f32.mrb[0].mxu1  ;;  %v683_v2 = vmul.f32 %v675_v0, %v675_v0 }
 0x268   : > { %v680_v62 = vpop.f32.mrb[1].mxu1  ;;  %v1652_v1 = vadd.f32 %v678_v59, %v599_v56 }
 0x269   : > { %v681_v63 = vadd.f32 %v680_v62, %v603_v57  ;;  %685 = vadd.xlane.f32.xlu1 %v683_v2 }
 0x26a   : > { %709 = vmax.xlane.f32.xlu0 %v1652_v1 }
 0x26b   : > { %v684_v3 = vmul.f32 %v681_v63, %v681_v63 }
 0x26d   : > { %687 = vadd.xlane.f32.xlu1 %v684_v3 }
 0x2f3   : > { %v708_v4 = vpop.xlane.xlu0 %707 }
 0x2f4   : > { %v711_v5 = vsub.f32 %v1650_v60, %v708_v4 }
 0x2f6   : > { %v713_v6 = vmul.f32 1.442695, %v711_v5  ;;  %v686_v12 = vpop.xlane.xlu1 %685 }
 0x2f7   : > { %v710_v7 = vpop.xlane.xlu0 %709  ;;  %v689_v13 = vmax.f32 %v686_v12, 0.0 }
 0x2f8   : > { %1149 = vpow2.f32 %v713_v6  ;;  %v712_v8 = vsub.f32 %v1652_v1, %v710_v7 }
 0x2f9   : > { %vm693_vm0 = vcmp.eq.f32.partialorder %v689_v13, inf  ;;  %v696_v24 = vand.u32 2147483648, %v689_v13  ;;  %vm695_vm1 = vcmp.eq.f32.partialorder %v689_v13, 0.0 }
 0x2fa   : > { %v715_v9 = vmul.f32 1.442695, %v712_v8  ;;  %v688_v14 = vpop.xlane.xlu1 %687 }
 0x2fb   : > { %v690_v15 = vmax.f32 %v688_v14, 0.0 }
 0x2fc   : > { %1151 = vpow2.f32 %v715_v9 }
 0x2fd   : > { %1153 = vrsqrt.f32 %v689_v13  ;;  %vm700_vm2 = vcmp.eq.f32.partialorder %v690_v15, inf  ;;  %v703_v31 = vand.u32 2147483648, %v690_v15  ;;  %vm702_vm3 = vcmp.eq.f32.partialorder %v690_v15, 0.0 }
 0x2fe   : > { %1155 = vrsqrt.f32 %v690_v15 }
 0x302   : > { %v1150_v10 = vpop.eup %1149 }
 0x303   : > { %717 = vadd.xlane.f32.xlu0 %v1150_v10 }
 0x306   : > { %v1152_v11 = vpop.eup %1151 }
 0x307   : > { %719 = vadd.xlane.f32.xlu1 %v1152_v11  ;;  %v1154_v17 = vpop.eup %1153 }
 0x308   : > { %v692_v19 = vmul.f32 %v1154_v17, %v689_v13  ;;  %v1156_v20 = vpop.eup %1155 }
 0x309   : > { %v699_v22 = vmul.f32 %v1156_v20, %v690_v15 }
 0x30a   : > { %v694_v21 = vsel %vm693_vm0, %v689_v13, %v692_v19 }
 0x30b   : > { %v697_v27 = vsel %vm695_vm1, %v696_v24, %v694_v21  ;;  %v701_v29 = vsel %vm700_vm2, %v690_v15, %v699_v22 }
 0x30c   : > { %v705_v32 = vmul.f32 0.5, %v697_v27  ;;  %v704_v35 = vsel %vm702_vm3, %v703_v31, %v701_v29 }
 0x30d   : > { %v706_v39 = vmul.f32 0.5, %v704_v35 }
 0x390   : > { %v718_v16 = vpop.xlane.xlu0 %717 }
 0x391   : > { %1157 = vlog2.f32 %v718_v16 }
 0x394   : > { %v720_v18 = vpop.xlane.xlu1 %719 }
 0x395   : > { %1159 = vlog2.f32 %v720_v18 }
 0x39b   : > { %v1158_v23 = vpop.eup %1157 }
 0x39c   : > { %v722_v25 = vmul.f32 0.6931472, %v1158_v23 }
 0x39e   : > { %v725_v28 = vadd.f32 %v722_v25, %v708_v4 }
 0x39f   : > { %v1160_v30 = vpop.eup %1159 }
 0x3a0   : > { %v727_v33 = vsub.f32 0.0, %v725_v28  ;;  %v724_v34 = vmul.f32 0.6931472, %v1160_v30 }
 0x3a2   : > { %v729_v36 = vadd.f32 %v727_v33, %v705_v32  ;;  %v726_v37 = vadd.f32 %v724_v34, %v710_v7 }
 0x3a4   : > { %v735_v38 = vsel %vm734_vm4, %v729_v36, 0.0  ;;  %v728_v40 = vsub.f32 0.0, %v726_v37 }
 0x3a5   : > { %v737_v41 = vsel %vm733_vm5, %v1650_v60, %v735_v38 }
 0x3a6   : > { %739 = vst [vmem:[#allocation9] sm:$0xff] %v737_v41  ;;  %v730_v42 = vadd.f32 %v728_v40, %v706_v39 }
 0x3a8   : > { %v736_v43 = vsel %vm734_vm4, %v730_v42, 0.0 }
 0x3a9   : > { %v738_v44 = vsel %vm733_vm5, %v1652_v1, %v736_v43 }
 0x3aa   : > { %740 = vst [vmem:[#allocation9 + $0x8] sm:$0xff] %v738_v44 }
 0x3ab PF: > { %p1086_p6 = scmp.eq.s32.totalorder %s1413_s24, 1  ;;  %s1351_s14 = smov [#allocation9]  }
 0x3ac   : > { %s750_s17 = sshll.u32 %s1351_s14, 4  ;;  %s751_s17 = int_to_ptr.vmem [resolvable:$true] %s750_s17 }
 0x3ad   : > { %s1249_s18 = scalar_lea.vmem %s751_s17, 256  ;;  %p1256_p0 = scmp.lt.s32.totalorder %s751_s17, %s751_s17 }
 0x3ae   : > { %p1250_p12 = scmp.ne.s32.totalorder %s751_s17, %s1249_s18  ;;  %p1257_p4 = scmp.lt.s32.totalorder %s1249_s18, %s1249_s18 }
 0x3b0   : > { %p1251_p1 = pnand %p1250_p12, %p1086_p6  ;;  %p1258_p7 = por %p1257_p4, %p1256_p0 }
 0x3b2   : > { %p1252_p2 = pneg %p1251_p1 }
 0x3b4   : > { %p1259_p9 = pnand %p1258_p7, %p1252_p2 }
 0x3b6   : > { %1262 = shalt.err (!%p1259_p9)
}
 0x3b7   : > { %s1263_s10 = scalar_lea.hbm %s1706_s5, 256 }
 0x3b8   : > { %p1264_p11 = scmp.ne.s32.totalorder %s1706_s5, %s1263_s10  ;;  %p1269_p10 = scmp.lt.u32.totalorder %s1263_s10, %s1706_s5 }
 0x3ba   : > { %p1265_p5 = pnand %p1264_p11, %p1086_p6 }
 0x3bc   : > { %p1266_p8 = pneg %p1265_p5 }
 0x3be   : > { %p1271_p13 = pnand %p1269_p10, %p1266_p8 }
 0x3c0   : > { %1274 = shalt.err (!%p1271_p13)
}
 0x3c1   : > { %s1352_s30 = smov 128   ;;  %s1353_s28 = smov 8  }
 0x3c2   : > { %1069 = dma.vmem_to_hbm [thread:$0]  (%p1086_p6), %s751_s17, 256, %s1706_s5, [#allocation5], %s1352_s30, %s1352_s30, %s1353_s28  }
 0x3c3   : > { %1312 = dma.done.wait (%p1086_p6), [#allocation5], 256  }
 0x3c4   : > { %1314 = vsyncadd (%p1086_p6), [#allocation5], 4294967040 }
 0x3c5 PF: > { %s22_s23 = sadd.s32 1, %s1337_s23   ;;  %s1727_s6 = sld [smem:[#allocation14_spill]] }
 0x3c6   : > { %p19_p3 = scmp.ge.s32.totalorder %s22_s23, 4   ;;  %s1728_s18 = smov %s1321_s19 }
 0x3c7   : > { %s1729_s19 = smov %s1325_s20  ;;  %s1730_s20 = smov %s1480_s15 }
 0x3c8   : > { %s1731_s21 = smov %s1333_s22  ;;  %21 = sbr.rel (!%p19_p3) target bundleno = 10 (0xa), region = 103 }
 0x3cb   : > { %s1732_s22 = smov %s1727_s6 }
 0x3cf   :  { %766 = vsyncpa [#allocation4], 1 }
 0x3d0   :  { %768 = vsyncpa [#allocation4 + $0x1], 1 }
 0x3d1   :  { %769 = vsyncpa [#allocation7], 1 }
 0x3d2   :  { %771 = vsyncpa [#allocation7 + $0x1], 1 }
 0x3d3   :  { %772 = vsyncpa [#allocation5], 1 }
 0x3d4   :  { %774 = vsyncpa [#allocation5 + $0x1], 1 }

// kernel: tpu_custom_call.1
= control target key start
LH: loop header
LB: loop body
LE: loop exit
PB: predicated region body
PF: predicated region fallthrough
CT: control target
= control target key end

     0   :  { %s1701_s0 = inlined_call_operand.hbm [shape: f32[16,1024], index: 0, kind: input, shape index: {}]   ;;  %s1702_s1 = inlined_call_operand.hbm [shape: f32[1024,128], index: 1, kind: input, shape index: {}]   ;;  %s1703_s2 = inlined_call_operand.vmem [shape: f32[1,128], index: 2, kind: input, shape index: {}]   ;;  %s1704_s3 = inlined_call_operand.hbm [shape: f32[128,256], index: 3, kind: input, shape index: {}]   ;;  %s1705_s4 = inlined_call_operand.vmem [shape: f32[1,256], index: 4, kind: input, shape index: {}]   ;;  %s1706_s5 = inlined_call_operand.hbm [shape: f32[16,128], index: 5, kind: output, shape index: {}]  }
   0x1   :  { %1712 = sst [smem:[#allocation15_spill]] %s1701_s0 }
   0x2   :  { %1713 = sst [smem:[#allocation16_spill]] %s1704_s3 }
   0x3   :  { %10 = vsyncpa [#allocation4], 0 }
   0x4   :  { %12 = vsyncpa [#allocation4 + $0x1], 0 }
   0x5   :  { %13 = vsyncpa [#allocation7], 0 }
   0x6   :  { %15 = vsyncpa [#allocation7 + $0x1], 0 }
   0x7   :  { %16 = vsyncpa [#allocation5], 0  ;;  %s1384_s18 = smov 0   ;;  %s1386_s19 = smov 0  }
   0x8   :  { %s1388_s20 = smov 0   ;;  %s1390_s21 = smov 0  }
   0x9   :  { %s1392_s22 = smov 0   ;;  %s1394_s23 = smov 0  }
   0xa LB: > { %s1413_s24 = sadd.s32 4294967295, %s1337_s23   ;;  %s43_s25 = sadd.s32 1, %s1325_s20  ;;  %s1337_s23 = sphi %s1394_s23, %s22_s23   ;;  %s1333_s22 = sphi %s1392_s22, %s1732_s22   ;;  %s1329_s21 = sphi %s1390_s21, %s1731_s21   ;;  %s1325_s20 = sphi %s1388_s20, %s1730_s20   ;;  %s1321_s19 = sphi %s1386_s19, %s1729_s19   ;;  %s1317_s18 = sphi %s1384_s18, %s1728_s18  }
   0xb   : > { %p50_p0 = scmp.ne.s32.totalorder %s1325_s20, %s1321_s19  ;;  %p51_p1 = scmp.eq.s32.totalorder %s1337_s23, 0 }
   0xc   : > { %p56_p2 = scmp.ne.s32.totalorder %s1321_s19, %s1317_s18  ;;  %p1707_p3 = scmp.eq.s32.totalorder %s1413_s24, 0 }
   0xd   : > { %p52_p4 = por %p51_p1, %p50_p0  ;;  %p850_p5 = scmp.ge.s32.totalorder %s1337_s23, 1 }
   0xe   : > { %p1424_p6 = por %p1707_p3, %p56_p2  ;;  %p182_p7 = scmp.lt.s32.totalorder %s1337_s23, 3 }
   0xf   : > { %s1339_s28 = smov [#allocation8]   ;;  %p1084_p10 = scmp.lt.s32.totalorder %s1337_s23, 2 }
  0x10   : > { %s1714_s26 = scalar_select %p1424_p6, 1, 0 }
  0x11   : > { %p1429_p8 = pnand %p850_p5, %p182_p7  ;;  %s197_s29 = sshll.u32 %s1339_s28, 4  ;;  %s198_s29 = int_to_ptr.vmem [resolvable:$true] %s197_s29 }
  0x12   : > { %p1442_p12 = pnand %p1084_p10, %p52_p4  ;;  %s31_s7 = sadd.s32 1, %s1333_s22 }
  0x13   : > { %s1715_s27 = scalar_select %p1429_p8, 1, 0 }
  0x14   : > { %p1072_p9 = pneg %p1429_p8  ;;  %s1718_s3 = sld [smem:[#allocation16_spill]] }
  0x15   : > { %s1717_s6 = scalar_select %p1442_p12, 1, 0 }
  0x16   : > { %p1438_p11 = pnand %p1072_p9, %p1707_p3 }
  0x18   : > { %p1163_p0 = pneg %p1438_p11 }
  0x1a   : > { %s1161_s10 = scalar_lea.hbm %s1718_s3, 4096 }
  0x1b   : > { %p1162_p13 = scmp.ne.s32.totalorder %s1718_s3, %s1161_s10  ;;  %p1168_p4 = scmp.lt.u32.totalorder %s1161_s10, %s1718_s3 }
  0x1d   : > { %p1164_p1 = pnand %p1163_p0, %p1162_p13 }
  0x1f   : > { %p1165_p2 = pneg %p1164_p1 }
  0x21   : > { %p1170_p5 = pnand %p1168_p4, %p1165_p2 }
  0x23   : > { %1173 = shalt.err (!%p1170_p5)
}
  0x24   : > { %s1174_s15 = scalar_lea.vmem %s198_s29, 4096  ;;  %p1182_p3 = scmp.lt.s32.totalorder %s198_s29, %s198_s29 }
  0x25   : > { %p1175_p7 = scmp.ne.s32.totalorder %s198_s29, %s1174_s15  ;;  %p1183_p6 = scmp.lt.s32.totalorder %s1174_s15, %s1174_s15 }
  0x27   : > { %p1177_p9 = pnand %p1175_p7, %p1163_p0  ;;  %p1184_p8 = por %p1183_p6, %p1182_p3 }
  0x29   : > { %p1178_p10 = pneg %p1177_p9 }
  0x2b   : > { %p1185_p12 = pnand %p1184_p8, %p1178_p10 }
  0x2d   : > { %1188 = shalt.err (!%p1185_p12)
}
  0x2e   : > { %s1340_s16 = smov 256   ;;  %s1341_s17 = smov 16  }
  0x2f   : > { %1075 = dma.hbm_to_vmem [thread:$0]  (!%p1438_p11), %s1718_s3, 4096, %s198_s29, [#allocation7], %s1340_s16, %s1340_s16, %s1341_s17  }
  0x30   : > { %p32_p13 = scmp.ge.s32.totalorder %s31_s7, 2  ;;  %s1464_s8 = sand.u32 1, %s1325_s20  }
  0x31   : > { %s870_s9 = sshll.u32 %s1333_s22, 9  ;;  %s853_s10 = sshll.u32 %s1464_s8, 6 }
  0x32   : > { %s1734_s7 = smov (%p32_p13, %s31_s7), 0  ;;  %s1720_s0 = sld [smem:[#allocation15_spill]] }
  0x33   : > { %1719 = sst [smem:[#allocation14_spill]] %s1734_s7  ;;  %s39_s11 = ssub.s32 %s1333_s22, %s1734_s7 }
  0x34   : > { %p41_p3 = scmp.eq.s32.totalorder %s39_s11, 0  ;;  %s218_s29 = scalar_lea.vmem [#allocation3], %s853_s10 }
  0x35   : > { %s228_s14 = sshll.u32 %s218_s29, 4  ;;  %s215_s17 = scalar_lea.sflag [#allocation4], %s1464_s8  ;;  %s1482_s14 = int_to_ptr.vmem [resolvable:$true] %s228_s14 }
  0x36   : > { %s1480_s15 = scalar_select %p41_p3, %s1325_s20, %s43_s25  }
  0x37   : > { %p1721_p8 = scmp.ne.s32.totalorder %s1717_s6, 0 }
  0x38   : > { %s1475_s13 = scalar_lea.hbm %s1720_s0, %s870_s9  ;;  %s1194_s10 = scalar_lea.hbm %s1720_s0, 2048 }
  0x39   : > { %s1189_s18 = scalar_lea.hbm %s1475_s13, 1024  ;;  %p1191_p11 = pneg %p1721_p8 }
  0x3a   : > { %p1190_p6 = scmp.ne.s32.totalorder %s1475_s13, %s1189_s18  ;;  %p1195_p1 = scmp.lt.u32.totalorder %s1475_s13, %s1720_s0 }
  0x3b   : > { %p1196_p2 = scmp.lt.u32.totalorder %s1194_s10, %s1189_s18  ;;  %p1198_p5 = scmp.lt.u32.totalorder %s1189_s18, %s1475_s13 }
  0x3c   : > { %p1192_p12 = pnand %p1191_p11, %p1190_p6 }
  0x3d   : > { %p1197_p4 = por %p1196_p2, %p1195_p1 }
  0x3e   : > { %p1193_p0 = pneg %p1192_p12 }
  0x3f   : > { %p1199_p7 = por %p1198_p5, %p1197_p4 }
  0x41   : > { %p1200_p9 = pnand %p1199_p7, %p1193_p0 }
  0x43   : > { %1203 = shalt.err (!%p1200_p9)
}
  0x44   : > { %s1204_s25 = scalar_lea.vmem %s1482_s14, 1024  ;;  %s1342_s30 = smov [#allocation3]  }
  0x45   : > { %p1205_p10 = scmp.ne.s32.totalorder %s1482_s14, %s1204_s25  ;;  %s1209_s29 = sshll.u32 %s1342_s30, 4  ;;  %s1210_s29 = int_to_ptr.vmem [resolvable:$false] %s1209_s29 }
  0x46   : > { %s1211_s28 = scalar_lea.vmem %s1210_s29, 2048  ;;  %p1212_p6 = scmp.lt.s32.totalorder %s1482_s14, %s1210_s29 }
  0x47   : > { %p1207_p13 = pnand %p1205_p10, %p1191_p11  ;;  %p1213_p12 = scmp.lt.s32.totalorder %s1211_s28, %s1204_s25 }
  0x49   : > { %p1208_p3 = pneg %p1207_p13  ;;  %p1214_p1 = por %p1213_p12, %p1212_p6 }
  0x4b   : > { %p1215_p2 = pnand %p1214_p1, %p1208_p3 }
  0x4d   : > { %1218 = shalt.err (!%p1215_p2)
}
  0x4e   : > { %s1343_s18 = smov 1024   ;;  %s1344_s9 = smov 512  }
  0x4f   : > { %s1345_s10 = smov 32   ;;  %s856_s11 = sshll.u32 %s1464_s8, 9 }
  0x50   : > { %1079 = dma.hbm_to_vmem [thread:$0]  (!%p1721_p8), %s1475_s13, 1024, %s1482_s14, %s215_s17, %s1343_s18, %s1344_s9, %s1345_s10  }
  0x51   : > { %s871_s12 = sshll.u32 %s1333_s22, 13  ;;  %s242_s28 = scalar_lea.vmem [#allocation6], %s856_s11 }
  0x52   : > { %s1518_s29 = scalar_lea.hbm %s1702_s1, %s871_s12  ;;  %s249_s16 = sshll.u32 %s242_s28, 4  ;;  %s1520_s16 = int_to_ptr.vmem [resolvable:$true] %s249_s16 }
  0x53   : > { %s1722_s0 = sand.u32 1, %s1337_s23   ;;  %s1219_s7 = scalar_lea.hbm %s1518_s29, 8192 }
  0x54   : > { %s1524_s3 = scalar_lea.sflag [#allocation7], %s1722_s0  ;;  %p1220_p0 = scmp.ne.s32.totalorder %s1518_s29, %s1219_s7 }
  0x55   : > { %s1224_s14 = scalar_lea.hbm %s1702_s1, 16384  ;;  %p1225_p7 = scmp.lt.u32.totalorder %s1518_s29, %s1702_s1 }
  0x56   : > { %p1222_p4 = pnand %p1220_p0, %p1191_p11  ;;  %p1226_p9 = scmp.lt.u32.totalorder %s1224_s14, %s1219_s7 }
  0x57   : > { %p1228_p13 = scmp.lt.u32.totalorder %s1219_s7, %s1518_s29 }
  0x58   : > { %p1223_p5 = pneg %p1222_p4  ;;  %p1227_p10 = por %p1226_p9, %p1225_p7 }
  0x5a   : > { %p1229_p3 = por %p1228_p13, %p1227_p10 }
  0x5c   : > { %p1230_p6 = pnand %p1229_p3, %p1223_p5 }
  0x5e   : > { %1233 = shalt.err (!%p1230_p6)
}
  0x5f   : > { %s1234_s0 = scalar_lea.vmem %s1520_s16, 8192  ;;  %s1346_s9 = smov [#allocation6]  }
  0x60   : > { %p1235_p12 = scmp.ne.s32.totalorder %s1520_s16, %s1234_s0  ;;  %s1239_s10 = sshll.u32 %s1346_s9, 4  ;;  %s1240_s10 = int_to_ptr.vmem [resolvable:$false] %s1239_s10 }
  0x61   : > { %s1241_s11 = scalar_lea.vmem %s1240_s10, 16384  ;;  %p1242_p0 = scmp.lt.s32.totalorder %s1520_s16, %s1240_s10 }
  0x62   : > { %p1237_p1 = pnand %p1235_p12, %p1191_p11  ;;  %p1243_p4 = scmp.lt.s32.totalorder %s1241_s11, %s1234_s0 }
  0x64   : > { %p1238_p2 = pneg %p1237_p1  ;;  %p1244_p7 = por %p1243_p4, %p1242_p0 }
  0x66   : > { %p1245_p9 = pnand %p1244_p7, %p1238_p2 }
  0x68   : > { %1248 = shalt.err (!%p1245_p9)
}
  0x69   : > { %s1347_s7 = smov 128   ;;  %s1348_s12 = smov 8  }
  0x6a   : > { %1082 = dma.hbm_to_vmem [thread:$0]  (!%p1721_p8), %s1518_s29, 8192, %s1520_s16, %s1524_s3, %s1347_s7, %s1347_s7, %s1348_s12  }
  0x6b   : > { %p1723_p11 = scmp.ne.s32.totalorder %s1715_s27, 0 }
  0x6c   : > { %s263_s25 = sand.u32 (!%p1723_p11), 1, %s1321_s19   ;;  %p1724_p5 = scmp.ne.s32.totalorder (!%p1723_p11), %s1714_s26, 0 }
  0x6d   : > { %261 = sbr.rel (%p1723_p11) target bundleno = 965 (0x3c5), region = 40  ;;  %s860_s30 = sshll.u32 (!%p1723_p11), %s263_s25, 6 }
  0x6e   : > { %s264_s28 = scalar_lea.sflag (!%p1723_p11), [#allocation4], %s263_s25  ;;  %s1553_s8 = scalar_lea.vmem (!%p1723_p11), [#allocation3], %s860_s30 }
  0x74   : > { %1300 = dma.done.wait (%p1724_p5), %s264_s28, 1024  }
  0x75   : > { %1302 = vsyncadd (%p1724_p5), %s264_s28, 4294966272  ;;  %s272_s13 = sand.u32 1, %s1413_s24   ;;  %s861_s6 = sshll.u32 %s263_s25, 9 }
  0x76   : > { %s273_s3 = scalar_lea.sflag [#allocation7], %s272_s13  ;;  %s1560_s16 = scalar_lea.vmem [#allocation6], %s861_s6 }
  0x77   : > { %1304 = dma.done.wait (%p1724_p5), %s273_s3, 8192  }
  0x78   : > { %1306 = vsyncadd (%p1724_p5), %s273_s3, 4294959104  ;;  %p1725_p8 = scmp.eq.s32.totalorder %s1413_s24, 0 }
  0x7a   : > { %1308 = dma.done.wait (%p1725_p8), [#allocation7], 4096   ;;  %p1726_p10 = pmov %p1725_p8 }
  0x7b   : > { %p863_p13 = scmp.ne.s32.totalorder %s1329_s21, 0 }
  0x7c   : > { %1310 = vsyncadd (%p1726_p10), [#allocation7], 4294963200  ;;  %v1349_v0 = vmov (!%p863_p13), 0.0  }
  0x7d   : > { %314 = sbr.rel (%p863_p13) target bundleno = 132 (0x84), region = 56  ;;  %315 = vst [vmem:[#allocation2] sm:$0xff] (!%p863_p13), %v1349_v0  ;;  %316 = vst [vmem:[#allocation2 + $0x8] sm:$0xff] (!%p863_p13), %v1349_v0 }
  0x84 PF: > { %v343_v1 = vld [vmem:[%s1560_s16 + $0x80] sm:$0xff]  ;;  %v344_v2 = vld [vmem:[%s1560_s16 + $0x88] sm:$0xff]  ;;  %v345_v12 = vld [vmem:[%s1560_s16 + $0x90] sm:$0xff]  ;;  %p864_p3 = scmp.ne.s32.totalorder %s1329_s21, 1 }
  0x85   : > { %v375_v3 = vld [vmem:[%s1560_s16 + $0x180] sm:$0xff]  ;;  %v948_v4 = vpack.c.bf16 %v344_v2, %v343_v1  ;;  %v376_v5 = vld [vmem:[%s1560_s16 + $0x188] sm:$0xff]  ;;  %v346_v14 = vld [vmem:[%s1560_s16 + $0x98] sm:$0xff] }
  0x86   : > { %v327_v6 = vld [vmem:[%s1560_s16] sm:$0xff]  ;;  %v328_v7 = vld [vmem:[%s1560_s16 + $0x8] sm:$0xff]  ;;  %v980_v8 = vpack.c.bf16 %v376_v5, %v375_v3  ;;  %v377_v15 = vld [vmem:[%s1560_s16 + $0x190] sm:$0xff]  ;;  %v952_v17 = vpack.c.bf16 %v346_v14, %v345_v12 }
  0x87   : > { %v950_v9 = vpack.c.bf16 %v328_v7, %v327_v6  ;;  %v359_v10 = vld [vmem:[%s1560_s16 + $0x100] sm:$0xff]  ;;  %v360_v11 = vld [vmem:[%s1560_s16 + $0x108] sm:$0xff]  ;;  %949 = vmatprep.subr.bf16.mxu0 %v948_v4  ;;  %v378_v16 = vld [vmem:[%s1560_s16 + $0x198] sm:$0xff] }
  0x88   : > { %v982_v13 = vpack.c.bf16 %v360_v11, %v359_v10  ;;  %981 = vmatprep.subr.bf16.mxu1 %v980_v8  ;;  %v984_v18 = vpack.c.bf16 %v378_v16, %v377_v15  ;;  %v329_v19 = vld [vmem:[%s1560_s16 + $0x10] sm:$0xff]  ;;  %v330_v20 = vld [vmem:[%s1560_s16 + $0x18] sm:$0xff]  ;;  %v347_v24 = vld [vmem:[%s1560_s16 + $0xa0] sm:$0xff] }
  0x89   : > { %951 = vmatpush3.bf16.msra.mxu0 %v950_v9  ;;  %v361_v21 = vld [vmem:[%s1560_s16 + $0x110] sm:$0xff]  ;;  %v954_v22 = vpack.c.bf16 %v330_v20, %v329_v19  ;;  %v362_v23 = vld [vmem:[%s1560_s16 + $0x118] sm:$0xff]  ;;  %v348_v25 = vld [vmem:[%s1560_s16 + $0xa8] sm:$0xff] }
  0x8a   : > { %983 = vmatpush3.bf16.msra.mxu1 %v982_v13  ;;  %953 = vmatprep.subr.bf16.mxu0 %v952_v17  ;;  %v986_v26 = vpack.c.bf16 %v362_v23, %v361_v21  ;;  %v956_v27 = vpack.c.bf16 %v348_v25, %v347_v24  ;;  %v379_v28 = vld [vmem:[%s1560_s16 + $0x1a0] sm:$0xff]  ;;  %v380_v29 = vld [vmem:[%s1560_s16 + $0x1a8] sm:$0xff]  ;;  %v349_v36 = vld [vmem:[%s1560_s16 + $0xb0] sm:$0xff] }
  0x8b   : > { %985 = vmatprep.subr.bf16.mxu1 %v984_v18  ;;  %v331_v30 = vld [vmem:[%s1560_s16 + $0x20] sm:$0xff]  ;;  %v988_v31 = vpack.c.bf16 %v380_v29, %v379_v28  ;;  %v332_v32 = vld [vmem:[%s1560_s16 + $0x28] sm:$0xff]  ;;  %v350_v37 = vld [vmem:[%s1560_s16 + $0xb8] sm:$0xff] }
  0x8c   : > { %v363_v33 = vld [vmem:[%s1560_s16 + $0x120] sm:$0xff]  ;;  %v364_v34 = vld [vmem:[%s1560_s16 + $0x128] sm:$0xff]  ;;  %v958_v35 = vpack.c.bf16 %v332_v32, %v331_v30  ;;  %v381_v38 = vld [vmem:[%s1560_s16 + $0x1b0] sm:$0xff]  ;;  %v960_v40 = vpack.c.bf16 %v350_v37, %v349_v36 }
  0x8d   : > { %955 = vmatpush3.bf16.msra.mxu0 %v954_v22  ;;  %v990_v39 = vpack.c.bf16 %v364_v34, %v363_v33  ;;  %v382_v41 = vld [vmem:[%s1560_s16 + $0x1b8] sm:$0xff]  ;;  %v333_v42 = vld [vmem:[%s1560_s16 + $0x30] sm:$0xff]  ;;  %v351_v47 = vld [vmem:[%s1560_s16 + $0xc0] sm:$0xff] }
  0x8e   : > { %987 = vmatpush3.bf16.msra.mxu1 %v986_v26  ;;  %957 = vmatprep.subr.bf16.mxu0 %v956_v27  ;;  %v334_v43 = vld [vmem:[%s1560_s16 + $0x38] sm:$0xff]  ;;  %v992_v44 = vpack.c.bf16 %v382_v41, %v381_v38  ;;  %v365_v45 = vld [vmem:[%s1560_s16 + $0x130] sm:$0xff]  ;;  %v352_v48 = vld [vmem:[%s1560_s16 + $0xc8] sm:$0xff] }
  0x8f   : > { %989 = vmatprep.subr.bf16.mxu1 %v988_v31  ;;  %v366_v46 = vld [vmem:[%s1560_s16 + $0x138] sm:$0xff]  ;;  %v383_v49 = vld [vmem:[%s1560_s16 + $0x1c0] sm:$0xff]  ;;  %v384_v50 = vld [vmem:[%s1560_s16 + $0x1c8] sm:$0xff]  ;;  %v962_v51 = vpack.c.bf16 %v334_v43, %v333_v42  ;;  %v964_v53 = vpack.c.bf16 %v352_v48, %v351_v47 }
  0x90   : > { %v994_v52 = vpack.c.bf16 %v366_v46, %v365_v45  ;;  %v335_v54 = vld [vmem:[%s1560_s16 + $0x40] sm:$0xff]  ;;  %v336_v55 = vld [vmem:[%s1560_s16 + $0x48] sm:$0xff]  ;;  %v996_v57 = vpack.c.bf16 %v384_v50, %v383_v49  ;;  %v353_v59 = vld [vmem:[%s1560_s16 + $0xd0] sm:$0xff] }
  0x91   : > { %959 = vmatpush3.bf16.msra.mxu0 %v958_v35  ;;  %v367_v56 = vld [vmem:[%s1560_s16 + $0x140] sm:$0xff]  ;;  %v368_v58 = vld [vmem:[%s1560_s16 + $0x148] sm:$0xff]  ;;  %v354_v60 = vld [vmem:[%s1560_s16 + $0xd8] sm:$0xff]  ;;  %v966_v63 = vpack.c.bf16 %v336_v55, %v335_v54 }
  0x92   : > { %991 = vmatpush3.bf16.msra.mxu1 %v990_v39  ;;  %961 = vmatprep.subr.bf16.mxu0 %v960_v40  ;;  %v385_v61 = vld [vmem:[%s1560_s16 + $0x1d0] sm:$0xff]  ;;  %v386_v62 = vld [vmem:[%s1560_s16 + $0x1d8] sm:$0xff]  ;;  %v998_v0 = vpack.c.bf16 %v368_v58, %v367_v56  ;;  %v968_v1 = vpack.c.bf16 %v354_v60, %v353_v59  ;;  %v355_v7 = vld [vmem:[%s1560_s16 + $0xe0] sm:$0xff] }
  0x93   : > { %993 = vmatprep.subr.bf16.mxu1 %v992_v44  ;;  %v337_v2 = vld [vmem:[%s1560_s16 + $0x50] sm:$0xff]  ;;  %v338_v3 = vld [vmem:[%s1560_s16 + $0x58] sm:$0xff]  ;;  %v1000_v5 = vpack.c.bf16 %v386_v62, %v385_v61  ;;  %v356_v8 = vld [vmem:[%s1560_s16 + $0xe8] sm:$0xff] }
  0x94   : > { %v369_v4 = vld [vmem:[%s1560_s16 + $0x150] sm:$0xff]  ;;  %v370_v6 = vld [vmem:[%s1560_s16 + $0x158] sm:$0xff]  ;;  %v387_v9 = vld [vmem:[%s1560_s16 + $0x1e0] sm:$0xff]  ;;  %v970_v11 = vpack.c.bf16 %v338_v3, %v337_v2  ;;  %v972_v15 = vpack.c.bf16 %v356_v8, %v355_v7  ;;  %v1350_v2 = vmov (!%p864_p3), 0.0  }
  0x95   : > { %963 = vmatpush3.bf16.msra.mxu0 %v962_v51  ;;  %v388_v10 = vld [vmem:[%s1560_s16 + $0x1e8] sm:$0xff]  ;;  %v339_v12 = vld [vmem:[%s1560_s16 + $0x60] sm:$0xff]  ;;  %v1002_v14 = vpack.c.bf16 %v370_v6, %v369_v4  ;;  %v322_v18 = vld [vmem:[%s1553_s8 + $0x18] sm:$0xff] }
  0x96   : > { %995 = vmatpush3.bf16.msra.mxu1 %v994_v52  ;;  %965 = vmatprep.subr.bf16.mxu0 %v964_v53  ;;  %v340_v13 = vld [vmem:[%s1560_s16 + $0x68] sm:$0xff]  ;;  %v371_v16 = vld [vmem:[%s1560_s16 + $0x160] sm:$0xff]  ;;  %v1004_v19 = vpack.c.bf16 %v388_v10, %v387_v9  ;;  %v357_v21 = vld [vmem:[%s1560_s16 + $0xf0] sm:$0xff] }
  0x97   : > { %997 = vmatprep.subr.bf16.mxu1 %v996_v57  ;;  %v320_v17 = vld [vmem:[%s1553_s8 + $0x8] sm:$0xff]  ;;  %v358_v22 = vld [vmem:[%s1560_s16 + $0xf8] sm:$0xff]  ;;  %v389_v23 = vld [vmem:[%s1560_s16 + $0x1f0] sm:$0xff]  ;;  %530 = vmatprep.mubr.f32.mxu1 %v322_v18  ;;  %v974_v25 = vpack.c.bf16 %v340_v13, %v339_v12 }
  0x98   : > { %v372_v20 = vld [vmem:[%s1560_s16 + $0x168] sm:$0xff]  ;;  %455 = vmatprep.mubr.f32.mxu0 %v320_v17  ;;  %v390_v24 = vld [vmem:[%s1560_s16 + $0x1f8] sm:$0xff]  ;;  %v976_v27 = vpack.c.bf16 %v358_v22, %v357_v21  ;;  %v341_v28 = vld [vmem:[%s1560_s16 + $0x70] sm:$0xff] }
  0x99   : > { %967 = vmatpush3.bf16.msra.mxu0 %v966_v63  ;;  %v1006_v26 = vpack.c.bf16 %v372_v20, %v371_v16  ;;  %v342_v29 = vld [vmem:[%s1560_s16 + $0x78] sm:$0xff]  ;;  %v1008_v30 = vpack.c.bf16 %v390_v24, %v389_v23  ;;  %v373_v31 = vld [vmem:[%s1560_s16 + $0x170] sm:$0xff]  ;;  %v319_v35 = vld [vmem:[%s1553_s8] sm:$0xff] }
  0x9a   : > { %999 = vmatpush3.bf16.msra.mxu1 %v998_v0  ;;  %969 = vmatprep.subr.bf16.mxu0 %v968_v1  ;;  %v374_v32 = vld [vmem:[%s1560_s16 + $0x178] sm:$0xff]  ;;  %v978_v33 = vpack.c.bf16 %v342_v29, %v341_v28  ;;  %v321_v36 = vld [vmem:[%s1553_s8 + $0x10] sm:$0xff]  ;;  %v324_v37 = vld [vmem:[%s1553_s8 + $0x28] sm:$0xff] }
  0x9b   : > { %1001 = vmatprep.subr.bf16.mxu1 %v1000_v5  ;;  %v1010_v34 = vpack.c.bf16 %v374_v32, %v373_v31  ;;  %v326_v38 = vld [vmem:[%s1553_s8 + $0x38] sm:$0xff]  ;;  %v323_v39 = vld [vmem:[%s1553_s8 + $0x20] sm:$0xff]  ;;  %v325_v40 = vld [vmem:[%s1553_s8 + $0x30] sm:$0xff] }
  0x9c   : > { %v317_v47 = vld [vmem:[#allocation2] sm:$0xff]  ;;  %v318_v56 = vld [vmem:[#allocation2 + $0x8] sm:$0xff]  ;;  %v563_v59 = vld [vmem:[#allocation8 + $0x8] sm:$0xff] (!%p864_p3) }
  0x9d   : > { %971 = vmatpush3.bf16.msra.mxu0 %v970_v11  ;;  %v565_v60 = vld [vmem:[#allocation8 + $0x18] sm:$0xff] (!%p864_p3)  ;;  %v562_v61 = vld [vmem:[#allocation8] sm:$0xff] (!%p864_p3)  ;;  %v564_v63 = vld [vmem:[#allocation8 + $0x10] sm:$0xff] (!%p864_p3) }
  0x9e   : > { %1003 = vmatpush3.bf16.msra.mxu1 %v1002_v14  ;;  %973 = vmatprep.subr.bf16.mxu0 %v972_v15  ;;  %v1012_v62 = vpack.c.bf16 (!%p864_p3), %v565_v60, %v563_v59  ;;  %v567_v0 = vld [vmem:[#allocation8 + $0x28] sm:$0xff] (!%p864_p3)  ;;  %v569_v1 = vld [vmem:[#allocation8 + $0x38] sm:$0xff] (!%p864_p3)  ;;  %v1014_v3 = vpack.c.bf16 (!%p864_p3), %v564_v63, %v562_v61  ;;  %v566_v5 = vld [vmem:[#allocation8 + $0x20] sm:$0xff] (!%p864_p3) }
  0x9f   : > { %1005 = vmatprep.subr.bf16.mxu1 %v1004_v19  ;;  %v1016_v4 = vpack.c.bf16 (!%p864_p3), %v569_v1, %v567_v0  ;;  %v568_v6 = vld [vmem:[#allocation8 + $0x30] sm:$0xff] (!%p864_p3)  ;;  %v571_v7 = vld [vmem:[#allocation8 + $0x48] sm:$0xff] (!%p864_p3)  ;;  %v573_v8 = vld [vmem:[#allocation8 + $0x58] sm:$0xff] (!%p864_p3) }
  0xa0   : > { %v1018_v9 = vpack.c.bf16 (!%p864_p3), %v568_v6, %v566_v5  ;;  %v1020_v10 = vpack.c.bf16 (!%p864_p3), %v573_v8, %v571_v7  ;;  %v570_v11 = vld [vmem:[#allocation8 + $0x40] sm:$0xff] (!%p864_p3)  ;;  %v572_v12 = vld [vmem:[#allocation8 + $0x50] sm:$0xff] (!%p864_p3)  ;;  %v575_v13 = vld [vmem:[#allocation8 + $0x68] sm:$0xff] (!%p864_p3) }
  0xa1   : > { %975 = vmatpush3.bf16.msra.mxu0 %v974_v25  ;;  %v577_v14 = vld [vmem:[#allocation8 + $0x78] sm:$0xff] (!%p864_p3)  ;;  %v1022_v15 = vpack.c.bf16 (!%p864_p3), %v572_v12, %v570_v11  ;;  %v574_v17 = vld [vmem:[#allocation8 + $0x60] sm:$0xff] (!%p864_p3)  ;;  %v576_v18 = vld [vmem:[#allocation8 + $0x70] sm:$0xff] (!%p864_p3) }
  0xa2   : > { %1007 = vmatpush3.bf16.msra.mxu1 %v1006_v26  ;;  %977 = vmatprep.subr.bf16.mxu0 %v976_v27  ;;  %v1024_v16 = vpack.c.bf16 (!%p864_p3), %v577_v14, %v575_v13  ;;  %v579_v19 = vld [vmem:[#allocation8 + $0x88] sm:$0xff] (!%p864_p3)  ;;  %v581_v20 = vld [vmem:[#allocation8 + $0x98] sm:$0xff] (!%p864_p3)  ;;  %v1026_v21 = vpack.c.bf16 (!%p864_p3), %v576_v18, %v574_v17  ;;  %v578_v23 = vld [vmem:[#allocation8 + $0x80] sm:$0xff] (!%p864_p3) }
  0xa3   : > { %1009 = vmatprep.subr.bf16.mxu1 %v1008_v30  ;;  %v1028_v22 = vpack.c.bf16 (!%p864_p3), %v581_v20, %v579_v19  ;;  %v580_v24 = vld [vmem:[#allocation8 + $0x90] sm:$0xff] (!%p864_p3)  ;;  %v583_v25 = vld [vmem:[#allocation8 + $0xa8] sm:$0xff] (!%p864_p3)  ;;  %v585_v26 = vld [vmem:[#allocation8 + $0xb8] sm:$0xff] (!%p864_p3) }
  0xa4   : > { %v1030_v27 = vpack.c.bf16 (!%p864_p3), %v580_v24, %v578_v23  ;;  %v1032_v28 = vpack.c.bf16 (!%p864_p3), %v585_v26, %v583_v25  ;;  %v582_v29 = vld [vmem:[#allocation8 + $0xa0] sm:$0xff] (!%p864_p3)  ;;  %v584_v30 = vld [vmem:[#allocation8 + $0xb0] sm:$0xff] (!%p864_p3)  ;;  %v587_v31 = vld [vmem:[#allocation8 + $0xc8] sm:$0xff] (!%p864_p3) }
  0xa5   : > { %979 = vmatpush3.bf16.msra.mxu0 %v978_v33  ;;  %v589_v32 = vld [vmem:[#allocation8 + $0xd8] sm:$0xff] (!%p864_p3)  ;;  %v1034_v33 = vpack.c.bf16 (!%p864_p3), %v584_v30, %v582_v29 }
  0xa6   : > { %1011 = vmatpush3.bf16.msra.mxu1 %v1010_v34  ;;  %1013 = vmatprep.subr.bf16.mxu0 (!%p864_p3), %v1012_v62  ;;  %v1036_v34 = vpack.c.bf16 (!%p864_p3), %v589_v32, %v587_v31 }
  0xa7   : > { %1044 = vmatprep.subr.bf16.mxu1 (!%p864_p3), %v1012_v62 }
  0xa8   : > { %456 = vmatmul.mubr.f32.vlgmr.msra.gmra.mrb[0].mxu0 %v319_v35  ;;  %v586_v35 = vld [vmem:[#allocation8 + $0xc0] sm:$0xff] (!%p864_p3) }
  0xa9   : > { %531 = vmatmul.mubr.f32.vlgmr.msra.gmra.mrb[0].mxu1 %v321_v36  ;;  %460 = vmatprep.mubr.f32.mxu0 %v324_v37  ;;  %v588_v36 = vld [vmem:[#allocation8 + $0xd0] sm:$0xff] (!%p864_p3)  ;;  %v591_v37 = vld [vmem:[#allocation8 + $0xe8] sm:$0xff] (!%p864_p3) }
  0xaa   : > { %535 = vmatprep.mubr.f32.mxu1 %v326_v38  ;;  %1015 = vmatpush1.bf16.msra.mxu0 (!%p864_p3), %v1014_v3  ;;  %v593_v38 = vld [vmem:[#allocation8 + $0xf8] sm:$0xff] (!%p864_p3) }
  0xab   : > { %1052 = vmatpush1.bf16.msra.mxu1 (!%p864_p3), %v1014_v3  ;;  %1017 = vmatprep.subr.bf16.mxu0 (!%p864_p3), %v1016_v4 }
  0xac   : > { %461 = vmatmul.mubr.f32.gmra.mrb[2].mxu0 %v323_v39  ;;  %1045 = vmatprep.subr.bf16.mxu1 (!%p864_p3), %v1016_v4  ;;  %v1038_v39 = vpack.c.bf16 (!%p864_p3), %v588_v36, %v586_v35 }
  0xad   : > { %536 = vmatmul.mubr.f32.gmra.mrb[2].mxu1 %v325_v40  ;;  %670 = vmatprep.mubr.f32.mxu0 (!%p864_p3), %v1350_v2 }
  0xae   : > { %676 = vmatprep.mubr.f32.mxu1 (!%p864_p3), %v1350_v2  ;;  %1019 = vmatpush1.bf16.msra.mxu0 (!%p864_p3), %v1018_v9 }
  0xaf   : > { %1053 = vmatpush1.bf16.msra.mxu1 (!%p864_p3), %v1018_v9  ;;  %1021 = vmatprep.subr.bf16.mxu0 (!%p864_p3), %v1020_v10 }
  0xb0   : > { %1046 = vmatprep.subr.bf16.mxu1 (!%p864_p3), %v1020_v10 }
  0xb2   : > { %1023 = vmatpush1.bf16.msra.mxu0 (!%p864_p3), %v1022_v15 }
  0xb3   : > { %1054 = vmatpush1.bf16.msra.mxu1 (!%p864_p3), %v1022_v15  ;;  %1025 = vmatprep.subr.bf16.mxu0 (!%p864_p3), %v1024_v16 }
  0xb4   : > { %1047 = vmatprep.subr.bf16.mxu1 (!%p864_p3), %v1024_v16 }
  0xb6   : > { %1027 = vmatpush1.bf16.msra.mxu0 (!%p864_p3), %v1026_v21 }
  0xb7   : > { %1055 = vmatpush1.bf16.msra.mxu1 (!%p864_p3), %v1026_v21  ;;  %1029 = vmatprep.subr.bf16.mxu0 (!%p864_p3), %v1028_v22 }
  0xb8   : > { %1048 = vmatprep.subr.bf16.mxu1 (!%p864_p3), %v1028_v22 }
  0xba   : > { %1031 = vmatpush1.bf16.msra.mxu0 (!%p864_p3), %v1030_v27 }
  0xbb   : > { %1056 = vmatpush1.bf16.msra.mxu1 (!%p864_p3), %v1030_v27  ;;  %1033 = vmatprep.subr.bf16.mxu0 (!%p864_p3), %v1032_v28 }
  0xbc   : > { %1049 = vmatprep.subr.bf16.mxu1 (!%p864_p3), %v1032_v28 }
  0xbe   : > { %1035 = vmatpush1.bf16.msra.mxu0 (!%p864_p3), %v1034_v33 }
  0xbf   : > { %1057 = vmatpush1.bf16.msra.mxu1 (!%p864_p3), %v1034_v33  ;;  %1037 = vmatprep.subr.bf16.mxu0 (!%p864_p3), %v1036_v34 }
  0xc0   : > { %1050 = vmatprep.subr.bf16.mxu1 (!%p864_p3), %v1036_v34 }
  0xc2   : > { %1039 = vmatpush1.bf16.msra.mxu0 (!%p864_p3), %v1038_v39 }
  0xc3   : > { %1058 = vmatpush1.bf16.msra.mxu1 (!%p864_p3), %v1038_v39 }
 0x17b   : > { %v904_v41 = vpop.f32.mrb[0].mxu0 }
 0x17c   : > { %v942_v42 = vpop.f32.mrb[0].mxu1  ;;  %v905_v43 = vpop.f32.mrb[1].mxu0 }
 0x17d   : > { %v906_v44 = vadd.f32 %v905_v43, %v904_v41  ;;  %v943_v45 = vpop.f32.mrb[1].mxu1  ;;  %v865_v41 = vld [vmem:[%s1703_s2] ss:$0 sm:$0xff] (!%p864_p3)  ;;  %v1040_v43 = vpack.c.bf16 (!%p864_p3), %v593_v38, %v591_v37 }
 0x17e   : > { %v944_v46 = vadd.f32 %v943_v45, %v942_v42  ;;  %v592_v45 = vld [vmem:[#allocation8 + $0xf0] sm:$0xff] (!%p864_p3) }
 0x17f   : > { %v907_v48 = vpop.f32.mrb[2].mxu0  ;;  %1041 = vmatprep.subr.bf16.mxu0 (!%p864_p3), %v1040_v43  ;;  %1051 = vmatprep.subr.bf16.mxu1 (!%p864_p3), %v1040_v43 }
 0x180   : > { %v533_v49 = vadd.f32 %v944_v46, %v906_v44  ;;  %v945_v50 = vpop.f32.mrb[2].mxu1  ;;  %v908_v51 = vpop.f32.mrb[3].mxu0  ;;  %v590_v44 = vld [vmem:[#allocation8 + $0xe0] sm:$0xff] (!%p864_p3) }
 0x181   : > { %v909_v52 = vadd.f32 %v908_v51, %v907_v48  ;;  %v946_v53 = vpop.f32.mrb[3].mxu1  ;;  %v1042_v48 = vpack.c.bf16 (!%p864_p3), %v592_v45, %v590_v44  ;;  %v596_v51 = vlaneseq (!%p864_p3) }
 0x182   : > { %v541_v54 = vadd.f32 %v533_v49, %v317_v47  ;;  %v947_v55 = vadd.f32 %v946_v53, %v945_v50  ;;  %548 = sbr.rel (%p864_p3) target bundleno = 939 (0x3ab), region = 60 }
 0x183   : > { %1043 = vmatpush1.bf16.msra.mxu0 (!%p864_p3), %v1042_v48  ;;  %1059 = vmatpush1.bf16.msra.mxu1 (!%p864_p3), %v1042_v48  ;;  %v732_v26 = vand.u32 (!%p864_p3), 127, %v596_v51 }
 0x184   : > { %543 = vst [vmem:[#allocation2] sm:$0xff] %v541_v54  ;;  %v538_v57 = vadd.f32 %v947_v55, %v909_v52  ;;  %v597_v52 = vshrl.u32 (!%p864_p3), %v596_v51, 7  ;;  %v594_v54 = vld [vmem:[%s1705_s4] sm:$0x3] (!%p864_p3) }
 0x185   : > { %vm734_vm4 = vcmp.eq.s32.totalorder (!%p864_p3), %v732_v26, 16  ;;  %vm733_vm5 = vcmp.lt.s32.totalorder (!%p864_p3), %v732_v26, 16 }
 0x186   : > { %v542_v58 = vadd.f32 %v538_v57, %v318_v56  ;;  %v598_v53 = vsub.s32 (!%p864_p3), 0, %v597_v52  ;;  %v602_v55 = vsub.s32 (!%p864_p3), 1, %v597_v52 }
 0x188   : > { %544 = vst [vmem:[#allocation2 + $0x8] sm:$0xff] %v542_v58  ;;  %v599_v56 = vrot.slane (!%p864_p3), %v594_v54, %v598_v53  ;;  %v603_v57 = vrot.slane (!%p864_p3), %v594_v54, %v602_v55 }
 0x18b   : > { %v549_v40 = vld [vmem:[#allocation2] sm:$0xff] }
 0x18c   : > { %v558_v46 = vadd.f32 %v865_v41, %v549_v40 }
 0x18e   : > { %v560_v49 = vmax.f32 %v558_v46, 0.0 }
 0x18f   : > { %v550_v42 = vld [vmem:[#allocation2 + $0x8] sm:$0xff] }
 0x190   : > { %v559_v47 = vadd.f32 %v865_v41, %v550_v42  ;;  %671 = vmatmul.mubr.f32.vlgmr.msra.gmra.mrb[0].mxu0 %v560_v49 }
 0x192   : > { %v561_v50 = vmax.f32 %v559_v47, 0.0 }
 0x194   : > { %677 = vmatmul.mubr.f32.vlgmr.msra.gmra.mrb[0].mxu1 %v561_v50 }
 0x263   : > { %v672_v58 = vpop.f32.mrb[0].mxu0 }
 0x264   : > { %v1650_v60 = vadd.f32 %v672_v58, %v599_v56  ;;  %v674_v61 = vpop.f32.mrb[1].mxu0 }
 0x265   : > { %v675_v0 = vadd.f32 %v674_v61, %v603_v57 }
 0x266   : > { %707 = vmax.xlane.f32.xlu0 %v1650_v60 }
 0x267   : > { %v678_v59 = vpop.f32.mrb[0].mxu1  ;;  %v683_v2 = vmul.f32 %v675_v0, %v675_v0 }
 0x268   : > { %v680_v62 = vpop.f32.mrb[1].mxu1  ;;  %v1652_v1 = vadd.f32 %v678_v59, %v599_v56 }
 0x269   : > { %v681_v63 = vadd.f32 %v680_v62, %v603_v57  ;;  %685 = vadd.xlane.f32.xlu1 %v683_v2 }
 0x26a   : > { %709 = vmax.xlane.f32.xlu0 %v1652_v1 }
 0x26b   : > { %v684_v3 = vmul.f32 %v681_v63, %v681_v63 }
 0x26d   : > { %687 = vadd.xlane.f32.xlu1 %v684_v3 }
 0x2f3   : > { %v708_v4 = vpop.xlane.xlu0 %707 }
 0x2f4   : > { %v711_v5 = vsub.f32 %v1650_v60, %v708_v4 }
 0x2f6   : > { %v713_v6 = vmul.f32 1.442695, %v711_v5  ;;  %v686_v12 = vpop.xlane.xlu1 %685 }
 0x2f7   : > { %v710_v7 = vpop.xlane.xlu0 %709  ;;  %v689_v13 = vmax.f32 %v686_v12, 0.0 }
 0x2f8   : > { %1149 = vpow2.f32 %v713_v6  ;;  %v712_v8 = vsub.f32 %v1652_v1, %v710_v7 }
 0x2f9   : > { %vm693_vm0 = vcmp.eq.f32.partialorder %v689_v13, inf  ;;  %v696_v24 = vand.u32 2147483648, %v689_v13  ;;  %vm695_vm1 = vcmp.eq.f32.partialorder %v689_v13, 0.0 }
 0x2fa   : > { %v715_v9 = vmul.f32 1.442695, %v712_v8  ;;  %v688_v14 = vpop.xlane.xlu1 %687 }
 0x2fb   : > { %v690_v15 = vmax.f32 %v688_v14, 0.0 }
 0x2fc   : > { %1151 = vpow2.f32 %v715_v9 }
 0x2fd   : > { %1153 = vrsqrt.f32 %v689_v13  ;;  %vm700_vm2 = vcmp.eq.f32.partialorder %v690_v15, inf  ;;  %v703_v31 = vand.u32 2147483648, %v690_v15  ;;  %vm702_vm3 = vcmp.eq.f32.partialorder %v690_v15, 0.0 }
 0x2fe   : > { %1155 = vrsqrt.f32 %v690_v15 }
 0x302   : > { %v1150_v10 = vpop.eup %1149 }
 0x303   : > { %717 = vadd.xlane.f32.xlu0 %v1150_v10 }
 0x306   : > { %v1152_v11 = vpop.eup %1151 }
 0x307   : > { %719 = vadd.xlane.f32.xlu1 %v1152_v11  ;;  %v1154_v17 = vpop.eup %1153 }
 0x308   : > { %v692_v19 = vmul.f32 %v1154_v17, %v689_v13  ;;  %v1156_v20 = vpop.eup %1155 }
 0x309   : > { %v699_v22 = vmul.f32 %v1156_v20, %v690_v15 }
 0x30a   : > { %v694_v21 = vsel %vm693_vm0, %v689_v13, %v692_v19 }
 0x30b   : > { %v697_v27 = vsel %vm695_vm1, %v696_v24, %v694_v21  ;;  %v701_v29 = vsel %vm700_vm2, %v690_v15, %v699_v22 }
 0x30c   : > { %v705_v32 = vmul.f32 0.5, %v697_v27  ;;  %v704_v35 = vsel %vm702_vm3, %v703_v31, %v701_v29 }
 0x30d   : > { %v706_v39 = vmul.f32 0.5, %v704_v35 }
 0x390   : > { %v718_v16 = vpop.xlane.xlu0 %717 }
 0x391   : > { %1157 = vlog2.f32 %v718_v16 }
 0x394   : > { %v720_v18 = vpop.xlane.xlu1 %719 }
 0x395   : > { %1159 = vlog2.f32 %v720_v18 }
 0x39b   : > { %v1158_v23 = vpop.eup %1157 }
 0x39c   : > { %v722_v25 = vmul.f32 0.6931472, %v1158_v23 }
 0x39e   : > { %v725_v28 = vadd.f32 %v722_v25, %v708_v4 }
 0x39f   : > { %v1160_v30 = vpop.eup %1159 }
 0x3a0   : > { %v727_v33 = vsub.f32 0.0, %v725_v28  ;;  %v724_v34 = vmul.f32 0.6931472, %v1160_v30 }
 0x3a2   : > { %v729_v36 = vadd.f32 %v727_v33, %v705_v32  ;;  %v726_v37 = vadd.f32 %v724_v34, %v710_v7 }
 0x3a4   : > { %v735_v38 = vsel %vm734_vm4, %v729_v36, 0.0  ;;  %v728_v40 = vsub.f32 0.0, %v726_v37 }
 0x3a5   : > { %v737_v41 = vsel %vm733_vm5, %v1650_v60, %v735_v38 }
 0x3a6   : > { %739 = vst [vmem:[#allocation9] sm:$0xff] %v737_v41  ;;  %v730_v42 = vadd.f32 %v728_v40, %v706_v39 }
 0x3a8   : > { %v736_v43 = vsel %vm734_vm4, %v730_v42, 0.0 }
 0x3a9   : > { %v738_v44 = vsel %vm733_vm5, %v1652_v1, %v736_v43 }
 0x3aa   : > { %740 = vst [vmem:[#allocation9 + $0x8] sm:$0xff] %v738_v44 }
 0x3ab PF: > { %p1086_p6 = scmp.eq.s32.totalorder %s1413_s24, 1  ;;  %s1351_s14 = smov [#allocation9]  }
 0x3ac   : > { %s750_s17 = sshll.u32 %s1351_s14, 4  ;;  %s751_s17 = int_to_ptr.vmem [resolvable:$true] %s750_s17 }
 0x3ad   : > { %s1249_s18 = scalar_lea.vmem %s751_s17, 256  ;;  %p1256_p0 = scmp.lt.s32.totalorder %s751_s17, %s751_s17 }
 0x3ae   : > { %p1250_p12 = scmp.ne.s32.totalorder %s751_s17, %s1249_s18  ;;  %p1257_p4 = scmp.lt.s32.totalorder %s1249_s18, %s1249_s18 }
 0x3b0   : > { %p1251_p1 = pnand %p1250_p12, %p1086_p6  ;;  %p1258_p7 = por %p1257_p4, %p1256_p0 }
 0x3b2   : > { %p1252_p2 = pneg %p1251_p1 }
 0x3b4   : > { %p1259_p9 = pnand %p1258_p7, %p1252_p2 }
 0x3b6   : > { %1262 = shalt.err (!%p1259_p9)
}
 0x3b7   : > { %s1263_s10 = scalar_lea.hbm %s1706_s5, 256 }
 0x3b8   : > { %p1264_p11 = scmp.ne.s32.totalorder %s1706_s5, %s1263_s10  ;;  %p1269_p10 = scmp.lt.u32.totalorder %s1263_s10, %s1706_s5 }
 0x3ba   : > { %p1265_p5 = pnand %p1264_p11, %p1086_p6 }
 0x3bc   : > { %p1266_p8 = pneg %p1265_p5 }
 0x3be   : > { %p1271_p13 = pnand %p1269_p10, %p1266_p8 }
 0x3c0   : > { %1274 = shalt.err (!%p1271_p13)
}
 0x3c1   : > { %s1352_s30 = smov 128   ;;  %s1353_s28 = smov 8  }
 0x3c2   : > { %1069 = dma.vmem_to_hbm [thread:$0]  (%p1086_p6), %s751_s17, 256, %s1706_s5, [#allocation5], %s1352_s30, %s1352_s30, %s1353_s28  }
 0x3c3   : > { %1312 = dma.done.wait (%p1086_p6), [#allocation5], 256  }
 0x3c4   : > { %1314 = vsyncadd (%p1086_p6), [#allocation5], 4294967040 }
 0x3c5 PF: > { %s22_s23 = sadd.s32 1, %s1337_s23   ;;  %s1727_s6 = sld [smem:[#allocation14_spill]] }
 0x3c6   : > { %p19_p3 = scmp.ge.s32.totalorder %s22_s23, 4   ;;  %s1728_s18 = smov %s1321_s19 }
 0x3c7   : > { %s1729_s19 = smov %s1325_s20  ;;  %s1730_s20 = smov %s1480_s15 }
 0x3c8   : > { %s1731_s21 = smov %s1333_s22  ;;  %21 = sbr.rel (!%p19_p3) target bundleno = 10 (0xa), region = 103 }
 0x3cb   : > { %s1732_s22 = smov %s1727_s6 }
 0x3cf   :  { %766 = vsyncpa [#allocation4], 1 }
 0x3d0   :  { %768 = vsyncpa [#allocation4 + $0x1], 1 }
 0x3d1   :  { %769 = vsyncpa [#allocation7], 1 }
 0x3d2   :  { %771 = vsyncpa [#allocation7 + $0x1], 1 }
 0x3d3   :  { %772 = vsyncpa [#allocation5], 1 }
 0x3d4   :  { %774 = vsyncpa [#allocation5 + $0x1], 1 }

</bundles_post_ra>
